<compile_context>
chip_gen: v7x
topology: tpu7x:2x2x1
jax: 0.10.0
libtpu: 0.0.40
codegen_flags: <defaults>
</compile_context>

<pallas_src>
import functools

import numpy as np
import jax
import jax.numpy as jnp
from jax import lax
from jax.experimental import pallas as pl
from jax.experimental.pallas import tpu as pltpu


def _round_up(x: int, m: int) -> int:
    return ((x + m - 1) // m) * m


def _hann_periodic(win_length: int) -> np.ndarray:
    # scipy.signal.get_window('hann', win_length, fftbins=True)
    n = np.arange(win_length)
    return (0.5 - 0.5 * np.cos(2.0 * np.pi * n / win_length)).astype(np.float32)


def _istft_kernel(mag_ref, ph_ref, bcos_ref, bsin_ref, ienv_ref, out_ref,
                  *, TT, r, hop_pad):
    # mag_ref/ph_ref: (1, 1, W, F)  staged slab (frames on sublanes, freq on lanes)
    # bcos_ref/bsin_ref: (F, N_pad) windowed inverse-rFFT bases, hop-block j at
    #                    lane offset j*hop_pad
    # ienv_ref: (TT, hop_pad)       out_ref: (1, TT, hop_pad)
    mag = mag_ref[0, 0]
    ph = ph_ref[0, 0]
    re = mag * jnp.cos(ph)          # Re(mag * e^{i phi})   (W, F)
    im = mag * jnp.sin(ph)          # Im(mag * e^{i phi})   (W, F)

    # Windowed inverse rFFT of all W staged frames as two canonical MXU matmuls
    # (M = W frames, K = F bins, N = N_pad samples), f32 accumulation.
    y = jnp.dot(re, bcos_ref[...], preferred_element_type=jnp.float32)
    y = y + jnp.dot(im, bsin_ref[...], preferred_element_type=jnp.float32)

    # Overlap-add in registers:  out[t] = sum_j y[t + (r-1) - j, hop-block j].
    # The slab carries the zero guard / halo frames, so every term is an
    # in-bounds static slice and every hop-block lane offset is 128-aligned.
    acc = y[r - 1:r - 1 + TT, 0:hop_pad]
    for j in range(1, r):
        acc = acc + y[r - 1 - j:r - 1 - j + TT, j * hop_pad:(j + 1) * hop_pad]

    out_ref[0] = acc * ienv_ref[...]


def make_istft_forward(filter_length=800, hop_length=200, win_length=800,
                       window='hann', frames_per_tile=None):
    """Returns forward(magnitude, phase) matching the PyTorch ISTFT module."""
    assert window == 'hann'
    N, hop = filter_length, hop_length
    assert N % hop == 0, "kernel assumes hop_length divides filter_length"
    r = N // hop
    assert r % 2 == 0, "kernel assumes (filter_length // hop_length) is even"
    half = r // 2
    off = half - 1                          # leading zero guard frames
    F = N // 2 + 1
    hop_pad = _round_up(hop, 128)           # 128-aligned lane blocks for the OLA
    N_pad = r * hop_pad

    if frames_per_tile is None:
        # W = TT + r - 1 <= 512 keeps the matmul M dim within two 256-wide MXU
        # passes (four on v5e) at ~99% utilization, and bounds per-tile VMEM.
        frames_per_tile = max(8, ((512 - (r - 1)) // 8) * 8)
    assert frames_per_tile % 8 == 0 and frames_per_tile >= 8
    TT_max = frames_per_tile

    # --- host-side constant setup -------------------------------------------
    w = _hann_periodic(win_length)
    if win_length < N:                      # torch.istft centers the window
        left = (N - win_length) // 2
        w = np.pad(w, (left, N - win_length - left))
    w = w.astype(np.float64)

    # One-sided inverse-rFFT cos/sin bases with the synthesis window folded in.
    n = np.arange(N)[None, :]
    kf = np.arange(F)[:, None]
    scale = np.full((F, 1), 2.0)
    scale[0, 0] = 1.0
    scale[-1, 0] = 1.0
    ang = 2.0 * np.pi * kf * n / N
    ct = scale * np.cos(ang) / N * w[None, :]       # (F, N) windowed cos basis
    st = -scale * np.sin(ang) / N * w[None, :]      # (F, N) windowed sin basis

    bcos_np = np.zeros((F, N_pad), np.float32)
    bsin_np = np.zeros((F, N_pad), np.float32)
    for j in range(r):
        cols = slice(j * hop_pad, j * hop_pad + hop)
        src = slice(j * hop, (j + 1) * hop)
        bcos_np[:, cols] = ct[:, src]
        bsin_np[:, cols] = st[:, src]
    bcos_j = jnp.asarray(bcos_np)
    bsin_j = jnp.asarray(bsin_np)

    @functools.lru_cache(maxsize=None)
    def _inv_envelope(T: int, rows: int):
        # window-square OLA envelope, vectorized & cached per (T, rows)
        w2 = (w ** 2).reshape(r, hop)
        c = np.cumsum(w2, axis=0)                           # c[k] = sum_{j<=k} w2[j]
        b = np.arange(T - 1 + r)
        env = c[np.minimum(b, r - 1)]                       # (T-1+r, hop)
        lower = b - T
        env = env - np.where(lower[:, None] >= 0,
                             c[np.clip(lower, 0, r - 1)], 0.0)
        env = env[half:half + T - 1]                        # center trim (T-1, hop)
        assert np.all(env > 1e-11), "window envelope has near-zero bins"
        inv = np.zeros((rows, hop_pad), np.float32)
        inv[:T - 1, :hop] = 1.0 / env
        return jnp.asarray(inv)

    _single_buffer_state = [True]           # fallback flag for pl.Buffered(1)

    def forward(magnitude, phase):
        B, Fin, T = magnitude.shape
        assert Fin == F and phase.shape == magnitude.shape
        assert T >= 2, "ISTFT needs at least 2 frames (output length hop*(T-1))"
        L = hop * (T - 1)

        TT = min(TT_max, _round_up(T - 1, 8))       # output rows per tile
        nt = -(-(T - 1) // TT)                      # number of frame tiles
        W = TT + r - 1                              # staged frames per tile (halo)
        T_stage = nt * TT + r - 1                   # zero-guarded staged frame count

        mag = magnitude.astype(jnp.float32)
        ph = phase.astype(jnp.float32)

        def stage(x):
            # (B, F, T) -> zero-guarded, halo-ed per-tile slabs (B, nt, W, F)
            # with frames on the sublane axis (canonical matmul LHS layout).
            xt = jnp.swapaxes(x, 1, 2)              # (B, T, F)
            xt = jnp.pad(xt, ((0, 0), (off, T_stage - off - T), (0, 0)))
            slabs = [lax.slice_in_dim(xt, k0 * TT, k0 * TT + W, axis=1)
                     for k0 in range(nt)]
            return jnp.stack(slabs, axis=1)

        mag_sl = stage(mag)
        ph_sl = stage(ph)
        ienv_j = _inv_envelope(T, nt * TT)

        kernel = functools.partial(_istft_kernel, TT=TT, r=r, hop_pad=hop_pad)

        flops = 4 * B * nt * W * F * N_pad          # two matmuls, 2*M*K*N each
        transcendentals = 2 * B * nt * W * F
        bytes_accessed = 4 * (2 * B * nt * W * F + 2 * F * N_pad
                              + nt * TT * hop_pad + B * nt * TT * hop_pad)
        cost = pl.CostEstimate(flops=flops, transcendentals=transcendentals,
                               bytes_accessed=bytes_accessed)

        vmem_bytes = 4 * (2 * 2 * W * F             # mag/ph slabs (double-buffered)
                          + 2 * F * N_pad           # bases (single-buffered)
                          + 2 * 2 * TT * hop_pad    # ienv + out (double-buffered)
                          + W * N_pad               # y temporary
                          + 2 * W * F               # re / im temporaries
                          + 4 * TT * hop_pad)       # OLA shifted slices + acc
        vmem_limit = int(min(max(vmem_bytes + (8 << 20), 16 << 20), 56 << 20))

        def _call(single_buffer_bases):
            if single_buffer_bases:
                def basis_spec():
                    return pl.BlockSpec((F, N_pad), lambda b, t: (0, 0),
                                        pipeline_mode=pl.Buffered(1))
            else:
                def basis_spec():
                    return pl.BlockSpec((F, N_pad), lambda b, t: (0, 0))
            return pl.pallas_call(
                kernel,
                out_shape=jax.ShapeDtypeStruct((B, nt * TT, hop_pad), jnp.float32),
                grid_spec=pltpu.PrefetchScalarGridSpec(
                    num_scalar_prefetch=0,
                    grid=(B, nt),
                    in_specs=[
                        pl.BlockSpec((1, 1, W, F), lambda b, t: (b, t, 0, 0)),
                        pl.BlockSpec((1, 1, W, F), lambda b, t: (b, t, 0, 0)),
                        basis_spec(),
                        basis_spec(),
                        pl.BlockSpec((TT, hop_pad), lambda b, t: (t, 0)),
                    ],
                    out_specs=pl.BlockSpec((1, TT, hop_pad),
                                           lambda b, t: (b, t, 0)),
                ),
                compiler_params=pltpu.CompilerParams(
                    dimension_semantics=("parallel", "parallel"),
                    vmem_limit_bytes=vmem_limit),
                cost_estimate=cost,
            )(mag_sl, ph_sl, bcos_j, bsin_j, ienv_j)

        if _single_buffer_state[0]:
            try:
                out_pad = _call(True)
            except Exception:       # single-buffering unsupported -> default bufs
                _single_buffer_state[0] = False
                out_pad = _call(False)
        else:
            out_pad = _call(False)

        # Drop row/lane padding (in-kernel stores stay 128-lane dense) and
        # reshape to the PyTorch output layout (B, 1, L).
        return out_pad[:, :T - 1, :hop].reshape(B, L)[:, None, :]

    return forward


def _numpy_reference(magnitude, phase, filter_length, hop_length, win_length):
    """Pure numpy torch.istft reference (center=True, onesided, hann)."""
    N, hop = filter_length, hop_length
    w = _hann_periodic(win_length).astype(np.float64)
    B, F, T = magnitude.shape
    spec = magnitude.astype(np.float64) * np.exp(1j * phase.astype(np.float64))
    frames = np.fft.irfft(spec, n=N, axis=1)                  # (B, N, T)
    L_full = N + hop * (T - 1)
    out = np.zeros((B, L_full))
    env = np.zeros(L_full)
    for t in range(T):
        out[:, t * hop:t * hop + N] += frames[:, :, t] * w[None, :]
        env[t * hop:t * hop + N] += w ** 2
    L = hop * (T - 1)
    out = out[:, N // 2:N // 2 + L] / env[None, N // 2:N // 2 + L]
    return out[:, None, :].astype(np.float32)                 # (B, 1, L)


if __name__ == "__main__":
    # small shapes: n_fft=64, hop=16, win=64  (same structure as 800/200/800)
    B, N_FFT, HOP, WIN = 2, 64, 16, 64
    F = N_FFT // 2 + 1

    key = jax.random.PRNGKey(0)
    k1, k2, k3, k4 = jax.random.split(key, 4)

    # Case 1: single frame tile.
    T1 = 8
    mag1 = jax.random.uniform(k1, (B, F, T1), jnp.float32, minval=0.1, maxval=1.0)
    ph1 = jax.random.uniform(k2, (B, F, T1), jnp.float32,
                             minval=-np.pi, maxval=np.pi)
    forward = make_istft_forward(N_FFT, HOP, WIN, 'hann')
    out1 = jax.block_until_ready(forward(mag1, ph1))
    assert out1.shape == (B, 1, HOP * (T1 - 1)), out1.shape
    assert out1.dtype == jnp.float32
    ref1 = _numpy_reference(np.asarray(mag1), np.asarray(ph1), N_FFT, HOP, WIN)
    np.testing.assert_allclose(np.asarray(out1), ref1, rtol=2e-3, atol=2e-3)

    # Case 2: multiple frame tiles (exercises the halo / T-tiling path: nt=3).
    T2 = 20
    mag2 = jax.random.uniform(k3, (B, F, T2), jnp.float32, minval=0.1, maxval=1.0)
    ph2 = jax.random.uniform(k4, (B, F, T2), jnp.float32,
                             minval=-np.pi, maxval=np.pi)
    forward_tiled = make_istft_forward(N_FFT, HOP, WIN, 'hann', frames_per_tile=8)
    out2 = jax.block_until_ready(forward_tiled(mag2, ph2))
    assert out2.shape == (B, 1, HOP * (T2 - 1)), out2.shape
    ref2 = _numpy_reference(np.asarray(mag2), np.asarray(ph2), N_FFT, HOP, WIN)
    np.testing.assert_allclose(np.asarray(out2), ref2, rtol=2e-3, atol=2e-3)

    print("KERNEL_OK")
</pallas_src>

<mosaic_0001>
module attributes {stable_mosaic.version = 11 : i64} {
  func.func @_istft_kernel(%arg0: i32, %arg1: i32, %arg2: memref<1x1x11x33xf32, #tpu.memory_space<vmem>>, %arg3: memref<1x1x11x33xf32, #tpu.memory_space<vmem>>, %arg4: memref<33x512xf32, #tpu.memory_space<vmem>>, %arg5: memref<33x512xf32, #tpu.memory_space<vmem>>, %arg6: memref<8x128xf32, #tpu.memory_space<vmem>>, %arg7: memref<1x8x128xf32, #tpu.memory_space<vmem>>) attributes {dimension_semantics = [#tpu.dimension_semantics<parallel>, #tpu.dimension_semantics<parallel>], iteration_bounds = array<i64: 2, 1>, scalar_prefetch = 0 : i64, scratch_operands = 0 : i64, tpu.core_type = #tpu.core_type<tc>, window_params = [{transform_indices = @transform_0, window_bounds = array<i64: 1, 1, 11, 33>}, {transform_indices = @transform_1, window_bounds = array<i64: 1, 1, 11, 33>}, {pipeline_mode = #tpu.pipeline_mode<synchronous>, transform_indices = @transform_2, window_bounds = array<i64: 33, 512>}, {pipeline_mode = #tpu.pipeline_mode<synchronous>, transform_indices = @transform_3, window_bounds = array<i64: 33, 512>}, {transform_indices = @transform_4, window_bounds = array<i64: 8, 128>}, {transform_indices = @transform_5, window_bounds = array<i64: 1, 8, 128>}]} {
    %c0 = arith.constant 0 : index
    %c0_0 = arith.constant 0 : index
    %c0_1 = arith.constant 0 : index
    %c0_2 = arith.constant 0 : index
    %0 = vector.load %arg2[%c0, %c0_0, %c0_1, %c0_2] : memref<1x1x11x33xf32, #tpu.memory_space<vmem>>, vector<1x1x11x33xf32>
    %1 = vector.shape_cast %0 : vector<1x1x11x33xf32> to vector<11x33xf32>
    %c0_3 = arith.constant 0 : index
    %c0_4 = arith.constant 0 : index
    %c0_5 = arith.constant 0 : index
    %c0_6 = arith.constant 0 : index
    %2 = vector.load %arg3[%c0_3, %c0_4, %c0_5, %c0_6] : memref<1x1x11x33xf32, #tpu.memory_space<vmem>>, vector<1x1x11x33xf32>
    %3 = vector.shape_cast %2 : vector<1x1x11x33xf32> to vector<11x33xf32>
    %4 = math.cos %3 : vector<11x33xf32>
    %5 = arith.mulf %1, %4 : vector<11x33xf32>
    %6 = math.sin %3 : vector<11x33xf32>
    %7 = arith.mulf %1, %6 : vector<11x33xf32>
    %c0_7 = arith.constant 0 : index
    %c0_8 = arith.constant 0 : index
    %8 = vector.load %arg4[%c0_7, %c0_8] : memref<33x512xf32, #tpu.memory_space<vmem>>, vector<33x512xf32>
    %cst = arith.constant dense<0.000000e+00> : vector<11x512xf32>
    %9 = tpu.matmul %5, %8, %cst {dimension_numbers = #tpu.dot_dimension_numbers<[1], [0], [0], [1], [0, 0, 1, 1], [], []>} : vector<11x33xf32>, vector<33x512xf32>, vector<11x512xf32> -> vector<11x512xf32>
    %c0_9 = arith.constant 0 : index
    %c0_10 = arith.constant 0 : index
    %10 = vector.load %arg5[%c0_9, %c0_10] : memref<33x512xf32, #tpu.memory_space<vmem>>, vector<33x512xf32>
    %cst_11 = arith.constant dense<0.000000e+00> : vector<11x512xf32>
    %11 = tpu.matmul %7, %10, %cst_11 {dimension_numbers = #tpu.dot_dimension_numbers<[1], [0], [0], [1], [0, 0, 1, 1], [], []>} : vector<11x33xf32>, vector<33x512xf32>, vector<11x512xf32> -> vector<11x512xf32>
    %12 = arith.addf %9, %11 : vector<11x512xf32>
    %13 = vector.extract_strided_slice %12 {offsets = [3, 0], sizes = [8, 128], strides = [1, 1]} : vector<11x512xf32> to vector<8x128xf32>
    %14 = vector.extract_strided_slice %12 {offsets = [2, 128], sizes = [8, 128], strides = [1, 1]} : vector<11x512xf32> to vector<8x128xf32>
    %15 = arith.addf %13, %14 : vector<8x128xf32>
    %16 = vector.extract_strided_slice %12 {offsets = [1, 256], sizes = [8, 128], strides = [1, 1]} : vector<11x512xf32> to vector<8x128xf32>
    %17 = arith.addf %15, %16 : vector<8x128xf32>
    %18 = vector.extract_strided_slice %12 {offsets = [0, 384], sizes = [8, 128], strides = [1, 1]} : vector<11x512xf32> to vector<8x128xf32>
    %19 = arith.addf %17, %18 : vector<8x128xf32>
    %c0_12 = arith.constant 0 : index
    %c0_13 = arith.constant 0 : index
    %20 = vector.load %arg6[%c0_12, %c0_13] : memref<8x128xf32, #tpu.memory_space<vmem>>, vector<8x128xf32>
    %21 = arith.mulf %19, %20 : vector<8x128xf32>
    %c0_14 = arith.constant 0 : index
    %c0_15 = arith.constant 0 : index
    %c0_16 = arith.constant 0 : index
    %22 = vector.load %arg7[%c0_14, %c0_15, %c0_16] : memref<1x8x128xf32, #tpu.memory_space<vmem>>, vector<1x8x128xf32>
    %23 = vector.shape_cast %22 : vector<1x8x128xf32> to vector<8x128xf32>
    %24 = vector.shape_cast %21 : vector<8x128xf32> to vector<1x8x128xf32>
    tpu.vector_store %arg7[%c0_14, %c0_15, %c0_16], %24 {strides = array<i32>} : memref<1x8x128xf32, #tpu.memory_space<vmem>>, vector<1x8x128xf32>,
    return
  }
  func.func @transform_0(%arg0: i32, %arg1: i32) -> (i32, i32, i32, i32) {
    %c0_i32 = arith.constant 0 : i32
    %c0_i32_0 = arith.constant 0 : i32
    %c0_i32_1 = arith.constant 0 : i32
    return %arg0, %arg1, %c0_i32, %c0_i32_0 : i32, i32, i32, i32
  }
  func.func @transform_1(%arg0: i32, %arg1: i32) -> (i32, i32, i32, i32) {
    %c0_i32 = arith.constant 0 : i32
    %c0_i32_0 = arith.constant 0 : i32
    %c0_i32_1 = arith.constant 0 : i32
    return %arg0, %arg1, %c0_i32, %c0_i32_0 : i32, i32, i32, i32
  }
  func.func @transform_2(%arg0: i32, %arg1: i32) -> (i32, i32) {
    %c0_i32 = arith.constant 0 : i32
    %c0_i32_0 = arith.constant 0 : i32
    %c0_i32_1 = arith.constant 0 : i32
    return %c0_i32, %c0_i32_0 : i32, i32
  }
  func.func @transform_3(%arg0: i32, %arg1: i32) -> (i32, i32) {
    %c0_i32 = arith.constant 0 : i32
    %c0_i32_0 = arith.constant 0 : i32
    %c0_i32_1 = arith.constant 0 : i32
    return %c0_i32, %c0_i32_0 : i32, i32
  }
  func.func @transform_4(%arg0: i32, %arg1: i32) -> (i32, i32) {
    %c0_i32 = arith.constant 0 : i32
    %c0_i32_0 = arith.constant 0 : i32
    return %arg1, %c0_i32 : i32, i32
  }
  func.func @transform_5(%arg0: i32, %arg1: i32) -> (i32, i32, i32) {
    %c0_i32 = arith.constant 0 : i32
    %c0_i32_0 = arith.constant 0 : i32
    return %arg0, %arg1, %c0_i32 : i32, i32, i32
  }
}

module attributes {stable_mosaic.version = 11 : i64} {
  func.func @_istft_kernel(%arg0: i32, %arg1: i32, %arg2: memref<1x1x11x33xf32, #tpu.memory_space<vmem>>, %arg3: memref<1x1x11x33xf32, #tpu.memory_space<vmem>>, %arg4: memref<33x512xf32, #tpu.memory_space<vmem>>, %arg5: memref<33x512xf32, #tpu.memory_space<vmem>>, %arg6: memref<8x128xf32, #tpu.memory_space<vmem>>, %arg7: memref<1x8x128xf32, #tpu.memory_space<vmem>>) attributes {dimension_semantics = [#tpu.dimension_semantics<parallel>, #tpu.dimension_semantics<parallel>], iteration_bounds = array<i64: 2, 1>, scalar_prefetch = 0 : i64, scratch_operands = 0 : i64, tpu.core_type = #tpu.core_type<tc>, window_params = [{transform_indices = @transform_0, window_bounds = array<i64: 1, 1, 11, 33>}, {transform_indices = @transform_1, window_bounds = array<i64: 1, 1, 11, 33>}, {pipeline_mode = #tpu.pipeline_mode<synchronous>, transform_indices = @transform_2, window_bounds = array<i64: 33, 512>}, {pipeline_mode = #tpu.pipeline_mode<synchronous>, transform_indices = @transform_3, window_bounds = array<i64: 33, 512>}, {transform_indices = @transform_4, window_bounds = array<i64: 8, 128>}, {transform_indices = @transform_5, window_bounds = array<i64: 1, 8, 128>}]} {
    %c0 = arith.constant 0 : index
    %c0_0 = arith.constant 0 : index
    %c0_1 = arith.constant 0 : index
    %c0_2 = arith.constant 0 : index
    %0 = vector.load %arg2[%c0, %c0_0, %c0_1, %c0_2] : memref<1x1x11x33xf32, #tpu.memory_space<vmem>>, vector<1x1x11x33xf32>
    %1 = vector.shape_cast %0 : vector<1x1x11x33xf32> to vector<11x33xf32>
    %c0_3 = arith.constant 0 : index
    %c0_4 = arith.constant 0 : index
    %c0_5 = arith.constant 0 : index
    %c0_6 = arith.constant 0 : index
    %2 = vector.load %arg3[%c0_3, %c0_4, %c0_5, %c0_6] : memref<1x1x11x33xf32, #tpu.memory_space<vmem>>, vector<1x1x11x33xf32>
    %3 = vector.shape_cast %2 : vector<1x1x11x33xf32> to vector<11x33xf32>
    %4 = math.cos %3 : vector<11x33xf32>
    %5 = arith.mulf %1, %4 : vector<11x33xf32>
    %6 = math.sin %3 : vector<11x33xf32>
    %7 = arith.mulf %1, %6 : vector<11x33xf32>
    %c0_7 = arith.constant 0 : index
    %c0_8 = arith.constant 0 : index
    %8 = vector.load %arg4[%c0_7, %c0_8] : memref<33x512xf32, #tpu.memory_space<vmem>>, vector<33x512xf32>
    %cst = arith.constant dense<0.000000e+00> : vector<11x512xf32>
    %9 = tpu.matmul %5, %8, %cst {dimension_numbers = #tpu.dot_dimension_numbers<[1], [0], [0], [1], [0, 0, 1, 1], [], []>} : vector<11x33xf32>, vector<33x512xf32>, vector<11x512xf32> -> vector<11x512xf32>
    %c0_9 = arith.constant 0 : index
    %c0_10 = arith.constant 0 : index
    %10 = vector.load %arg5[%c0_9, %c0_10] : memref<33x512xf32, #tpu.memory_space<vmem>>, vector<33x512xf32>
    %cst_11 = arith.constant dense<0.000000e+00> : vector<11x512xf32>
    %11 = tpu.matmul %7, %10, %cst_11 {dimension_numbers = #tpu.dot_dimension_numbers<[1], [0], [0], [1], [0, 0, 1, 1], [], []>} : vector<11x33xf32>, vector<33x512xf32>, vector<11x512xf32> -> vector<11x512xf32>
    %12 = arith.addf %9, %11 : vector<11x512xf32>
    %13 = vector.extract_strided_slice %12 {offsets = [3, 0], sizes = [8, 128], strides = [1, 1]} : vector<11x512xf32> to vector<8x128xf32>
    %14 = vector.extract_strided_slice %12 {offsets = [2, 128], sizes = [8, 128], strides = [1, 1]} : vector<11x512xf32> to vector<8x128xf32>
    %15 = arith.addf %13, %14 : vector<8x128xf32>
    %16 = vector.extract_strided_slice %12 {offsets = [1, 256], sizes = [8, 128], strides = [1, 1]} : vector<11x512xf32> to vector<8x128xf32>
    %17 = arith.addf %15, %16 : vector<8x128xf32>
    %18 = vector.extract_strided_slice %12 {offsets = [0, 384], sizes = [8, 128], strides = [1, 1]} : vector<11x512xf32> to vector<8x128xf32>
    %19 = arith.addf %17, %18 : vector<8x128xf32>
    %c0_12 = arith.constant 0 : index
    %c0_13 = arith.constant 0 : index
    %20 = vector.load %arg6[%c0_12, %c0_13] : memref<8x128xf32, #tpu.memory_space<vmem>>, vector<8x128xf32>
    %21 = arith.mulf %19, %20 : vector<8x128xf32>
    %c0_14 = arith.constant 0 : index
    %c0_15 = arith.constant 0 : index
    %c0_16 = arith.constant 0 : index
    %22 = vector.load %arg7[%c0_14, %c0_15, %c0_16] : memref<1x8x128xf32, #tpu.memory_space<vmem>>, vector<1x8x128xf32>
    %23 = vector.shape_cast %22 : vector<1x8x128xf32> to vector<8x128xf32>
    %24 = vector.shape_cast %21 : vector<8x128xf32> to vector<1x8x128xf32>
    tpu.vector_store %arg7[%c0_14, %c0_15, %c0_16], %24 {strides = array<i32>} : memref<1x8x128xf32, #tpu.memory_space<vmem>>, vector<1x8x128xf32>,
    return
  }
  func.func @transform_0(%arg0: i32, %arg1: i32) -> (i32, i32, i32, i32) {
    %c0_i32 = arith.constant 0 : i32
    %c0_i32_0 = arith.constant 0 : i32
    %c0_i32_1 = arith.constant 0 : i32
    return %arg0, %arg1, %c0_i32, %c0_i32_0 : i32, i32, i32, i32
  }
  func.func @transform_1(%arg0: i32, %arg1: i32) -> (i32, i32, i32, i32) {
    %c0_i32 = arith.constant 0 : i32
    %c0_i32_0 = arith.constant 0 : i32
    %c0_i32_1 = arith.constant 0 : i32
    return %arg0, %arg1, %c0_i32, %c0_i32_0 : i32, i32, i32, i32
  }
  func.func @transform_2(%arg0: i32, %arg1: i32) -> (i32, i32) {
    %c0_i32 = arith.constant 0 : i32
    %c0_i32_0 = arith.constant 0 : i32
    %c0_i32_1 = arith.constant 0 : i32
    return %c0_i32, %c0_i32_0 : i32, i32
  }
  func.func @transform_3(%arg0: i32, %arg1: i32) -> (i32, i32) {
    %c0_i32 = arith.constant 0 : i32
    %c0_i32_0 = arith.constant 0 : i32
    %c0_i32_1 = arith.constant 0 : i32
    return %c0_i32, %c0_i32_0 : i32, i32
  }
  func.func @transform_4(%arg0: i32, %arg1: i32) -> (i32, i32) {
    %c0_i32 = arith.constant 0 : i32
    %c0_i32_0 = arith.constant 0 : i32
    return %arg1, %c0_i32 : i32, i32
  }
  func.func @transform_5(%arg0: i32, %arg1: i32) -> (i32, i32, i32) {
    %c0_i32 = arith.constant 0 : i32
    %c0_i32_0 = arith.constant 0 : i32
    return %arg0, %arg1, %c0_i32 : i32, i32, i32
  }
}

</mosaic_0001>

<bundles_post_ra>
// kernel: tpu_custom_call.1
= control target key start
LH: loop header
LB: loop body
LE: loop exit
PB: predicated region body
PF: predicated region fallthrough
CT: control target
= control target key end

     0   :  { %10 = vsyncpa [#allocation3], 0  ;;  %s2010_s0 = inlined_call_operand.vmem [shape: f32[2,1,11,33], index: 0, kind: input, shape index: {}]   ;;  %s2011_s1 = inlined_call_operand.vmem [shape: f32[2,1,11,33], index: 1, kind: input, shape index: {}]   ;;  %s2012_s2 = inlined_call_operand.hbm [shape: f32[33,512], index: 2, kind: input, shape index: {}]   ;;  %s2013_s3 = inlined_call_operand.hbm [shape: f32[33,512], index: 3, kind: input, shape index: {}]   ;;  %s2014_s4 = inlined_call_operand.vmem [shape: f32[8,128], index: 4, kind: input, shape index: {}]   ;;  %s2015_s5 = inlined_call_operand.hbm [shape: f32[2,8,128], index: 5, kind: output, shape index: {}]  }
   0x1   :  { %11 = vsyncpa [#allocation6], 0 }
   0x2   :  { %12 = vsyncpa [#allocation4], 0 }
   0x3   :  { %14 = vsyncpa [#allocation4 + $0x1], 0  ;;  %s1700_s18 = smov 0   ;;  %s1702_s19 = smov 0  }
   0x4   :  { %s1704_s20 = smov 0   ;;  %s1706_s21 = smov 0  }
   0x5   :  { %s1708_s22 = smov 0   ;;  %s1710_s23 = smov 0  }
   0x6 LB: > { %s1320_s24 = sadd.s32 4294967295, %s1656_s23   ;;  %s1321_s25 = sadd.s32 4294967294, %s1656_s23   ;;  %s1656_s23 = sphi %s1710_s23, %s20_s23   ;;  %s1652_s22 = sphi %s1708_s22, %s2036_s22   ;;  %s1648_s21 = sphi %s1706_s21, %s2035_s21   ;;  %s1644_s20 = sphi %s1704_s20, %s2034_s20   ;;  %s1640_s19 = sphi %s1702_s19, %s2033_s19   ;;  %s1636_s18 = sphi %s1700_s18, %s2032_s18  }
   0x7   : > { %s32_s26 = sadd.s32 1, %s1652_s22  ;;  %s165_s27 = sadd.s32 1, %s1644_s20 }
   0x8   : > { %p34_p0 = scmp.ge.s32.totalorder %s32_s26, 2  ;;  %p175_p1 = scmp.ne.s32.totalorder %s1644_s20, %s1640_s19 }
   0x9   : > { %p176_p2 = scmp.eq.s32.totalorder %s1320_s24, 1  ;;  %p181_p3 = scmp.ne.s32.totalorder %s1640_s19, %s1636_s18 }
   0xa   : > { %s2038_s26 = smov (%p34_p0, %s32_s26), 0  ;;  %p182_p5 = scmp.eq.s32.totalorder %s1321_s25, 1 }
   0xb   : > { %2021 = sst [smem:[#allocation11_spill]] %s2038_s26  ;;  %p1740_p4 = por %p176_p2, %p175_p1 }
   0xc   : > { %s160_s29 = ssub.s32 %s1652_s22, %s2038_s26  ;;  %p1322_p6 = scmp.ge.s32.totalorder %s1656_s23, 1 }
   0xd   : > { %s2022_s28 = scalar_select %p1740_p4, 1, 0 }
   0xe   : > { %p163_p7 = scmp.eq.s32.totalorder %s160_s29, 0  ;;  %p1747_p8 = por %p182_p5, %p181_p3 }
   0xf   : > { %p189_p9 = scmp.lt.s32.totalorder %s1656_s23, 3  ;;  %p1759_p11 = scmp.eq.s32.totalorder %s1320_s24, 0 }
  0x10   : > { %s2023_s30 = scalar_select %p1747_p8, 1, 0 }
  0x11   : > { %s1753_s6 = scalar_select %p163_p7, %s1644_s20, %s165_s27  }
  0x12   : > { %p1755_p10 = pnand %p1322_p6, %p189_p9  ;;  %s1658_s9 = smov [#allocation2]  }
  0x13   : > { %s2025_s8 = scalar_select %p1759_p11, 1, 0 }
  0x14   : > { %s2024_s7 = scalar_select %p1755_p10, 1, 0 }
  0x15   : > { %p1431_p12 = pneg %p1755_p10  ;;  %s201_s10 = sshll.u32 %s1658_s9, 4  ;;  %s202_s10 = int_to_ptr.vmem [resolvable:$true] %s201_s10 }
  0x16   : > { %s1659_s12 = smov [#allocation5]   ;;  %s1514_s16 = scalar_lea.hbm %s2012_s2, 2560 }
  0x17   : > { %p1767_p13 = pnand %p1759_p11, %p1431_p12  ;;  %s214_s13 = sshll.u32 %s1659_s12, 4  ;;  %s1771_s13 = int_to_ptr.vmem [resolvable:$true] %s214_s13 }
  0x18   : > { %p1515_p0 = scmp.ne.s32.totalorder %s2012_s2, %s1514_s16  ;;  %p1521_p5 = scmp.lt.u32.totalorder %s1514_s16, %s2012_s2 }
  0x19   : > { %p1516_p1 = pneg %p1767_p13 }
  0x1b   : > { %p1517_p2 = pnand %p1516_p1, %p1515_p0 }
  0x1d   : > { %p1518_p3 = pneg %p1517_p2 }
  0x1f   : > { %p1523_p6 = pnand %p1521_p5, %p1518_p3 }
  0x21   : > { %1526 = shalt.err (!%p1523_p6)
}
  0x22   : > { %s1527_s29 = scalar_lea.vmem %s202_s10, 2560  ;;  %p1535_p8 = scmp.lt.s32.totalorder %s202_s10, %s202_s10 }
  0x23   : > { %p1528_p7 = scmp.ne.s32.totalorder %s202_s10, %s1527_s29  ;;  %p1536_p4 = scmp.lt.s32.totalorder %s1527_s29, %s1527_s29 }
  0x25   : > { %p1530_p9 = pnand %p1528_p7, %p1516_p1  ;;  %p1537_p11 = por %p1536_p4, %p1535_p8 }
  0x27   : > { %p1531_p12 = pneg %p1530_p9 }
  0x29   : > { %p1538_p10 = pnand %p1537_p11, %p1531_p12 }
  0x2b   : > { %1541 = shalt.err (!%p1538_p10)
}
  0x2c   : > { %s1660_s9 = smov 512   ;;  %s1661_s12 = smov 32  }
  0x2d   : > { %1434 = dma.hbm_to_vmem [thread:$0]  (!%p1767_p13), %s2012_s2, 2560, %s202_s10, [#allocation3], %s1660_s9, %s1660_s9, %s1661_s12  }
  0x2e   : > { %s1542_s24 = scalar_lea.hbm %s2013_s3, 2560 }
  0x2f   : > { %p1543_p0 = scmp.ne.s32.totalorder %s2013_s3, %s1542_s24  ;;  %p1549_p10 = scmp.lt.u32.totalorder %s1542_s24, %s2013_s3 }
  0x31   : > { %p1545_p4 = pnand %p1543_p0, %p1516_p1 }
  0x33   : > { %p1546_p8 = pneg %p1545_p4 }
  0x35   : > { %p1551_p11 = pnand %p1549_p10, %p1546_p8 }
  0x37   : > { %1554 = shalt.err (!%p1551_p11)
}
  0x38   : > { %s1555_s10 = scalar_lea.vmem %s1771_s13, 2560  ;;  %p1563_p6 = scmp.lt.s32.totalorder %s1771_s13, %s1771_s13 }
  0x39   : > { %p1556_p2 = scmp.ne.s32.totalorder %s1771_s13, %s1555_s10  ;;  %p1564_p7 = scmp.lt.s32.totalorder %s1555_s10, %s1555_s10 }
  0x3b   : > { %p1558_p3 = pnand %p1556_p2, %p1516_p1  ;;  %p1565_p9 = por %p1564_p7, %p1563_p6 }
  0x3d   : > { %p1559_p5 = pneg %p1558_p3 }
  0x3f   : > { %p1566_p12 = pnand %p1565_p9, %p1559_p5 }
  0x41   : > { %1569 = shalt.err (!%p1566_p12)
}
  0x42   : > { %1437 = dma.hbm_to_vmem [thread:$0]  (!%p1767_p13), %s2013_s3, 2560, %s1771_s13, [#allocation6], %s1660_s9, %s1660_s9, %s1661_s12  }
  0x43   : > { %p2027_p0 = scmp.ne.s32.totalorder %s2024_s7, 0 }
  0x44   : > { %p2028_p4 = scmp.ne.s32.totalorder (!%p2027_p0), %s2025_s8, 0 }
  0x45   : > { %261 = sbr.rel (%p2027_p0) target bundleno = 424 (0x1a8), region = 40 }
  0x4c   : > { %1623 = dma.done.wait (%p2028_p4), [#allocation3], 2560  }
  0x4d   : > { %1625 = vsyncadd (%p2028_p4), [#allocation3], 4294964736 }
  0x4e   : > { %1627 = dma.done.wait (%p2028_p4), [#allocation6], 2560  }
  0x4f   : > { %1629 = vsyncadd (%p2028_p4), [#allocation6], 4294964736  ;;  %v1662_v0 = vmov 0.0   ;;  %p310_p13 = scmp.lt.s32.totalorder %s1648_s21, 1  ;;  %v775_v1 = vld [vmem:[#allocation5 + $0x8] sm:$0xff]  ;;  %v777_v3 = vld [vmem:[#allocation5 + $0x18] sm:$0xff] }
  0x50   : > { %878 = vmatprep.mubr.f32.mxu0 %v1662_v0  ;;  %955 = vmatprep.mubr.f32.mxu1 %v1662_v0  ;;  %v779_v2 = vld [vmem:[#allocation5 + $0x28] sm:$0xff]  ;;  %v781_v5 = vld [vmem:[#allocation5 + $0x38] sm:$0xff]  ;;  %v774_v6 = vld [vmem:[#allocation5] sm:$0xff]  ;;  %vm801_vm0 = vcmask 1040384   ;;  %v1663_v59 = vmov 683565275  }
  0x51   : > { %s1834_s7 = scalar_select %p310_p13, %s1648_s21, 1  ;;  %v1373_v4 = vpack.c.bf16 %v779_v2, %v775_v1  ;;  %v778_v7 = vld [vmem:[#allocation5 + $0x20] sm:$0xff]  ;;  %v1381_v8 = vpack.c.bf16 %v781_v5, %v777_v3  ;;  %v776_v10 = vld [vmem:[#allocation5 + $0x10] sm:$0xff]  ;;  %v783_v12 = vld [vmem:[#allocation5 + $0x48] sm:$0xff]  ;;  %v1664_v61 = vmov 2475754826  }
  0x52   : > { %v1375_v9 = vpack.c.bf16 %v778_v7, %v774_v6  ;;  %v780_v11 = vld [vmem:[#allocation5 + $0x30] sm:$0xff]  ;;  %v787_v14 = vld [vmem:[#allocation5 + $0x68] sm:$0xff]  ;;  %v785_v15 = vld [vmem:[#allocation5 + $0x58] sm:$0xff]  ;;  %v1665_v63 = vmov 2131351028   ;;  %s307_s25 = sand.u32 1, %s1640_s19  }
  0x53   : > { %s1371_s8 = sshll.u32 %s1834_s7, 4  ;;  %1374 = vmatprep.subr.bf16.mxu0 %v1373_v4  ;;  %v1383_v13 = vpack.c.bf16 %v780_v11, %v776_v10  ;;  %v789_v16 = vld [vmem:[#allocation5 + $0x78] sm:$0xff]  ;;  %1382 = vmatprep.subr.bf16.mxu1 %v1381_v8  ;;  %v1377_v17 = vpack.c.bf16 %v787_v14, %v783_v12  ;;  %v782_v19 = vld [vmem:[#allocation5 + $0x40] sm:$0xff]  ;;  %v784_v21 = vld [vmem:[#allocation5 + $0x50] sm:$0xff]  ;;  %v1666_v2 = vmov 2102212464  }
  0x54   : > { %1376 = vmatpush1.bf16.msra.mxu0 %v1375_v9  ;;  %v1385_v18 = vpack.c.bf16 %v789_v16, %v785_v15  ;;  %v786_v20 = vld [vmem:[#allocation5 + $0x60] sm:$0xff]  ;;  %v788_v23 = vld [vmem:[#allocation5 + $0x70] sm:$0xff]  ;;  %s327_s9 = scalar_lea.vmem %s2011_s1, %s1371_s8  ;;  %v791_v25 = vld [vmem:[#allocation5 + $0x88] sm:$0x1]  ;;  %v1667_v4 = vmov 920167782   ;;  %s1919_s16 = scalar_lea.vmem %s2010_s0, %s1371_s8 }
  0x55   : > { %1384 = vmatpush1.bf16.msra.mxu1 %v1383_v13  ;;  %v1379_v22 = vpack.c.bf16 %v786_v20, %v782_v19  ;;  %1378 = vmatprep.subr.bf16.mxu0 %v1377_v17  ;;  %v1387_v24 = vpack.c.bf16 %v788_v23, %v784_v21  ;;  %v793_v26 = vld [vmem:[#allocation5 + $0x98] sm:$0x1]  ;;  %v755_v27 = vld [vmem:[#allocation2 + $0x8] sm:$0xff]  ;;  %v1842_v31 = vld [vmem:[%s327_s9] sm:$0xff]  ;;  %v1668_v12 = vmov 1326507024  }
  0x56   : > { %1386 = vmatprep.subr.bf16.mxu1 %v1385_v18  ;;  %v759_v28 = vld [vmem:[#allocation2 + $0x28] sm:$0xff]  ;;  %v757_v29 = vld [vmem:[#allocation2 + $0x18] sm:$0xff]  ;;  %v790_v33 = vld [vmem:[#allocation5 + $0x80] sm:$0x1]  ;;  %v336_v35 = vand.u32 2147483647, %v1842_v31 }
  0x57   : > { %v761_v30 = vld [vmem:[#allocation2 + $0x38] sm:$0xff]  ;;  %v1844_v32 = vld [vmem:[%s327_s9 + $0x8] sm:$0x7]  ;;  %v1389_v34 = vpack.c.bf16 %v759_v28, %v755_v27  ;;  %v339_v36 = vand.u32 2139095040, %v1842_v31  ;;  %v792_v37 = vld [vmem:[#allocation5 + $0x90] sm:$0x1] }
  0x58   : > { %1380 = vmatpush1.bf16.msra.mxu0 %v1379_v22  ;;  %v1397_v38 = vpack.c.bf16 %v761_v30, %v757_v29  ;;  %v439_v39 = vand.u32 2147483647, %v1844_v32  ;;  %v442_v40 = vand.u32 2139095040, %v1844_v32  ;;  %v343_v42 = vand.u32 8388607, %v336_v35  ;;  %s1330_s27 = sshll.u32 %s307_s25, 3 }
  0x59   : > { %1388 = vmatpush1.bf16.msra.mxu1 %v1387_v24  ;;  %1351 = vmatprep.subr.msk.mxu0 %vm801_vm0, %v791_v25  ;;  %v340_v41 = vshrl.u32 %v339_v36, 23  ;;  %vm338_vm15 = vcmp.lt.s32.totalorder %v1842_v31, 0  ;;  %s309_s29 = scalar_lea.vmem [#allocation7], %s1330_s27  ;;  %s1368_s10 = sshll.u32 %s1648_s21, 7 }
  0x5a   : > { %1355 = vmatprep.subr.msk.mxu1 %vm801_vm0, %v793_v26  ;;  %v443_v43 = vshrl.u32 %v442_v40, 23  ;;  %v446_v44 = vand.u32 8388607, %v439_v39  ;;  %v344_v48 = vor.u32 8388608, %v343_v42  ;;  %s1185_s26 = sshll.u32 %s309_s29, 4  ;;  %s1963_s8 = scalar_lea.hbm %s2015_s5, %s1368_s10  ;;  %s1965_s26 = int_to_ptr.vmem [resolvable:$true] %s1185_s26 }
  0x5b   : > { %v1335_v45 = vadd.s32 4294967169, %v340_v41  ;;  %s1171_s11 = scalar_lea.sflag [#allocation4], %s307_s25  ;;  %s1570_s13 = scalar_lea.vmem %s1965_s26, 128 }
  0x5c   : > { %1352 = vmatpush1.msk.msra.mxu0 %vm801_vm0, %v790_v33  ;;  %v1339_v46 = vadd.s32 4294967169, %v443_v43  ;;  %v447_v49 = vor.u32 8388608, %v446_v44  ;;  %v1858_v55 = vshll.u32 %v344_v48, 8  ;;  %p1571_p1 = scmp.ne.s32.totalorder %s1965_s26, %s1570_s13  ;;  %p2029_p8 = scmp.ne.s32.totalorder %s2022_s28, 0 }
  0x5d   : > { %1356 = vmatpush1.msk.msra.mxu1 %vm801_vm0, %v792_v37  ;;  %1390 = vmatprep.subr.bf16.mxu0 %v1389_v34  ;;  %v346_v47 = vadd.s32 1, %v1335_v45  ;;  %s1669_s21 = smov [#allocation7]  }
  0x5e   : > { %1398 = vmatprep.subr.bf16.mxu1 %v1397_v38  ;;  %v449_v50 = vadd.s32 1, %v1339_v46  ;;  %v1860_v57 = vshll.u32 %v447_v49, 8  ;;  %p1572_p10 = pnand %p1571_p1, %p2029_p8  ;;  %s1574_s9 = sshll.u32 %s1669_s21, 4  ;;  %s1575_s9 = int_to_ptr.vmem [resolvable:$false] %s1574_s9 }
  0x5f   : > { %vm347_vm1 = vcmp.gt.s32.totalorder %v346_v47, 0  ;;  %s1576_s12 = scalar_lea.vmem %s1575_s9, 256  ;;  %p1577_p2 = scmp.lt.s32.totalorder %s1965_s26, %s1575_s9 }
  0x60   : > { %v348_v51 = vsel %vm347_vm1, %v346_v47, 0  ;;  %vm450_vm2 = vcmp.gt.s32.totalorder %v449_v50, 0  ;;  %vm337_vm1 = vcmp.le.f32.partialorder %v336_v35, 0.7853982  ;;  %p1573_p11 = pneg %p1572_p10  ;;  %p1578_p3 = scmp.lt.s32.totalorder %s1576_s12, %s1570_s13 }
  0x61   : > { %v349_v52 = vshrl.u32 %v348_v51, 5  ;;  %v350_v53 = vand.u32 31, %v348_v51  ;;  %v451_v54 = vsel %vm450_vm2, %v449_v50, 0  ;;  %vm441_vm2 = vcmp.lt.s32.totalorder %v1844_v32, 0 }
  0x62   : > { %v453_v56 = vand.u32 31, %v451_v54  ;;  %v1862_v6 = vshrl.u32 %v451_v54, 5  ;;  %p1579_p5 = por %p1578_p3, %p1577_p2 }
  0x63   : > { %v351_v58 = vsub.s32 32, %v350_v53  ;;  %v353_v60 = vshll.u32 %v1663_v59, %v350_v53  ;;  %v356_v62 = vshll.u32 %v1664_v61, %v350_v53  ;;  %v359_v1 = vshll.u32 %v1665_v63, %v350_v53 }
  0x64   : > { %v362_v3 = vshll.u32 %v1666_v2, %v350_v53  ;;  %v365_v5 = vshll.u32 %v1667_v4, %v350_v53  ;;  %vm368_vm3 = vcmp.lt.s32.totalorder %v349_v52, 1  ;;  %vm369_vm4 = vcmp.lt.s32.totalorder %v349_v52, 2  ;;  %p1580_p6 = pnand %p1579_p5, %p1573_p11 }
  0x65   : > { %v352_v7 = vshrl.u32 %v1663_v59, %v351_v58  ;;  %v354_v8 = vshrl.u32 %v1664_v61, %v351_v58  ;;  %v357_v9 = vshrl.u32 %v1665_v63, %v351_v58  ;;  %v360_v10 = vshrl.u32 %v1666_v2, %v351_v58 }
  0x66   : > { %v363_v11 = vshrl.u32 %v1667_v4, %v351_v58  ;;  %v366_v13 = vshrl.u32 %v1668_v12, %v351_v58  ;;  %vm371_vm5 = vcmp.lt.s32.totalorder %v349_v52, 4  ;;  %v454_v17 = vsub.s32 32, %v453_v56 }
  0x67   : > { %v355_v14 = vor.u32 %v354_v8, %v353_v60  ;;  %v358_v15 = vor.u32 %v357_v9, %v356_v62  ;;  %v361_v16 = vor.u32 %v360_v10, %v359_v1  ;;  %vm370_vm6 = vcmp.lt.s32.totalorder %v349_v52, 3 }
  0x68   : > { %v364_v18 = vor.u32 %v363_v11, %v362_v3  ;;  %v367_v19 = vor.u32 %v366_v13, %v365_v5  ;;  %v456_v20 = vshll.u32 %v1663_v59, %v453_v56  ;;  %v459_v28 = vshll.u32 %v1664_v61, %v453_v56 }
  0x69   : > { %v372_v21 = vsel %vm368_vm3, %v352_v7, %v355_v14  ;;  %v373_v22 = vsel %vm371_vm5, %v361_v16, 2102212464  ;;  %v376_v23 = vsel %vm368_vm3, %v355_v14, %v358_v15  ;;  %v380_v24 = vsel %vm368_vm3, %v358_v15, %v361_v16 }
  0x6a   : > { %v374_v25 = vsel %vm370_vm6, %v358_v15, %v373_v22  ;;  %v377_v26 = vsel %vm371_vm5, %v364_v18, 920167782  ;;  %v381_v27 = vsel %vm371_vm5, %v367_v19, 1326507024  ;;  %v455_v33 = vshrl.u32 %v1663_v59, %v454_v17 }
  0x6b   : > { %v378_v29 = vsel %vm370_vm6, %v361_v16, %v377_v26  ;;  %v382_v30 = vsel %vm370_vm6, %v364_v18, %v381_v27  ;;  %v457_v34 = vshrl.u32 %v1664_v61, %v454_v17  ;;  %v375_v36 = vsel %vm369_vm4, %v372_v21, %v374_v25 }
  0x6c   : > { %v379_v37 = vsel %vm369_vm4, %v376_v23, %v378_v29  ;;  %v383_v38 = vsel %vm369_vm4, %v380_v24, %v382_v30  ;;  %v460_v40 = vshrl.u32 %v1665_v63, %v454_v17  ;;  %v462_v47 = vshll.u32 %v1665_v63, %v453_v56 }
  0x6d   : > { %v1871_v41 = vmul.u32.u64.low %v1858_v55, %v383_v38  ;;  %v1872_v42 = vmul.u32.u64.high %v1858_v55, %v383_v38, %v1871_v41  ;;  %v1875_v43 = vmul.u32.u64.low %v1858_v55, %v379_v37  ;;  %v1876_v44 = vmul.u32.u64.high %v1858_v55, %v379_v37, %v1875_v43 }
  0x6e   : > { %v458_v45 = vor.u32 %v457_v34, %v456_v20  ;;  %v461_v46 = vor.u32 %v460_v40, %v459_v28  ;;  %v463_v48 = vshrl.u32 %v1666_v2, %v454_v17  ;;  %v465_v49 = vshll.u32 %v1666_v2, %v453_v56 }
  0x6f   : > { %v466_v50 = vshrl.u32 %v1667_v4, %v454_v17  ;;  %v468_v51 = vshll.u32 %v1667_v4, %v453_v56  ;;  %v469_v53 = vshrl.u32 %v1668_v12, %v454_v17  ;;  %v391_v52 = vmul.u32 %v1858_v55, %v375_v36 }
  0x70   : > { %v464_v54 = vor.u32 %v463_v48, %v462_v47  ;;  %vm471_vm7 = vcmp.lt.s32.totalorder %v1862_v6, 1  ;;  %vm472_vm8 = vcmp.lt.s32.totalorder %v1862_v6, 2  ;;  %vm393_vm9 = vc.u32 %v1872_v42, %v1875_v43 }
  0x71   : > { %v394_v58 = vadd.s32 1, %v1876_v44  ;;  %v467_v59 = vor.u32 %v466_v50, %v465_v49  ;;  %vm473_vm10 = vcmp.lt.s32.totalorder %v1862_v6, 3  ;;  %v470_v60 = vor.u32 %v469_v53, %v468_v51 }
  0x72   : > { %vm474_vm11 = vcmp.lt.s32.totalorder %v1862_v6, 4  ;;  %v475_v61 = vsel %vm471_vm7, %v455_v33, %v458_v45  ;;  %v479_v56 = vsel %vm471_vm7, %v458_v45, %v461_v46  ;;  %v483_v1 = vsel %vm471_vm7, %v461_v46, %v464_v54 }
  0x73   : > { %v395_v62 = vsel %vm393_vm9, %v394_v58, %v1876_v44  ;;  %v476_v55 = vsel %vm474_vm11, %v464_v54, 2102212464  ;;  %v480_v63 = vsel %vm474_vm11, %v467_v59, 920167782  ;;  %v484_v5 = vsel %vm474_vm11, %v470_v60, 1326507024 }
  0x74   : > { %v396_v2 = vadd.s32 %v395_v62, %v391_v52  ;;  %v477_v3 = vsel %vm473_vm10, %v461_v46, %v476_v55  ;;  %v481_v4 = vsel %vm473_vm10, %v464_v54, %v480_v63  ;;  %v485_v9 = vsel %vm473_vm10, %v467_v59, %v484_v5 }
  0x75   : > { %v478_v7 = vsel %vm472_vm8, %v475_v61, %v477_v3  ;;  %v482_v8 = vsel %vm472_vm8, %v479_v56, %v481_v4  ;;  %v486_v11 = vsel %vm472_vm8, %v483_v1, %v485_v9  ;;  %v392_v30 = vadd.s32 %v1875_v43, %v1872_v42 }
  0x76   : > { %v397_v10 = vadd.s32 536870912, %v396_v2  ;;  %v1893_v12 = vmul.u32.u64.low %v1860_v57, %v482_v8  ;;  %v1894_v13 = vmul.u32.u64.high %v1860_v57, %v482_v8, %v1893_v12  ;;  %v494_v17 = vmul.u32 %v1860_v57, %v478_v7 }
  0x77   : > { %v1897_v14 = vmul.u32.u64.low %v1860_v57, %v486_v11  ;;  %v1898_v15 = vmul.u32.u64.high %v1860_v57, %v486_v11, %v1897_v14  ;;  %vm440_vm3 = vcmp.le.f32.partialorder %v439_v39, 0.7853982  ;;  %vm428_vm10 = vweird.f32 %v1842_v31 }
  0x78   : > { %v398_v16 = vshrl.u32 %v397_v10, 30  ;;  %v497_v19 = vadd.s32 1, %v1894_v13  ;;  %vm794_vm11 = vcmask 269312  }
  0x79   : > { %vm496_vm12 = vc.u32 %v1898_v15, %v1893_v12  ;;  %v495_v50 = vadd.s32 %v1893_v12, %v1898_v15 }
  0x7a   : > { %v399_v18 = vshll.u32 %v398_v16, 30  ;;  %v498_v6 = vsel %vm496_vm12, %v497_v19, %v1894_v13  ;;  %v422_v42 = vsub.s32 4, %v398_v16  ;;  %v332_v19 = vld [vmem:[%s1919_s16] sm:$0xff] }
  0x7b   : > { %v499_v21 = vadd.s32 %v498_v6, %v494_v17  ;;  %v754_v6 = vld [vmem:[#allocation2] sm:$0xff] }
  0x7c   : > { %v400_v20 = vsub.s32 %v396_v2, %v399_v18  ;;  %v423_v56 = vsel %vm338_vm15, %v422_v42, %v398_v16 }
  0x7d   : > { %v500_v23 = vadd.s32 536870912, %v499_v21  ;;  %v425_v2 = vsel %vm337_vm1, 0, %v423_v56  ;;  %v333_v56 = vld [vmem:[%s1919_s16 + $0x8] sm:$0x7] }
  0x7e   : > { %v402_v22 = vsub.s32 0, %v400_v20  ;;  %v637_v8 = vadd.s32 3, %v425_v2  ;;  %v429_v11 = vand.u32 3, %v425_v2 }
  0x7f   : > { %v501_v25 = vshrl.u32 %v500_v23, 30 }
  0x80   : > { %v1336_v24 = vmin.u32 %v402_v22, %v400_v20  ;;  %v638_v12 = vand.u32 3, %v637_v8  ;;  %vm434_vm4 = vcmp.eq.s32.totalorder %v429_v11, 2  ;;  %vm431_vm6 = vcmp.eq.s32.totalorder %v429_v11, 0 }
  0x81   : > { %v502_v27 = vshll.u32 %v501_v25, 30  ;;  %v525_v7 = vsub.s32 4, %v501_v25  ;;  %vm430_vm8 = vcmp.lt.s32.totalorder %v429_v11, 2 }
  0x82   : > { %v404_v26 = vclz %v1336_v24  ;;  %vm643_vm5 = vcmp.eq.s32.totalorder %v638_v12, 2  ;;  %vm640_vm7 = vcmp.eq.s32.totalorder %v638_v12, 0  ;;  %vm639_vm9 = vcmp.lt.s32.totalorder %v638_v12, 2  ;;  %v756_v24 = vld [vmem:[#allocation2 + $0x10] sm:$0xff] }
  0x83   : > { %v503_v29 = vsub.s32 %v499_v21, %v502_v27  ;;  %v526_v10 = vsel %vm441_vm2, %v525_v7, %v501_v25  ;;  %v758_v21 = vld [vmem:[#allocation2 + $0x20] sm:$0xff]  ;;  %v760_v25 = vld [vmem:[#allocation2 + $0x30] sm:$0xff] }
  0x84   : > { %v1337_v28 = vadd.s32 4294967294, %v404_v26  ;;  %v528_v15 = vsel %vm440_vm3, 0, %v526_v10  ;;  %v763_v26 = vld [vmem:[#allocation2 + $0x48] sm:$0xff]  ;;  %v772_v7 = vld [vmem:[#allocation2 + $0x90] sm:$0x1] }
  0x85   : > { %v505_v33 = vsub.s32 0, %v503_v29  ;;  %v741_v18 = vadd.s32 3, %v528_v15 }
  0x86   : > { %vm1338_vm13 = vcmp.lt.s32.totalorder %v1337_v28, 0 }
  0x87   : > { %v407_v57 = vsel %vm1338_vm13, 0, %v1337_v28  ;;  %v1340_v38 = vmin.u32 %v505_v33, %v503_v29 }
  0x88   : > { %v408_v34 = vsub.s32 32, %v407_v57  ;;  %v409_v36 = vshll.u32 %v400_v20, %v407_v57  ;;  %v412_v37 = vsub.s32 4294967266, %v407_v57  ;;  %v769_v57 = vld [vmem:[#allocation2 + $0x78] sm:$0xff] }
  0x89   : > { %v507_v44 = vclz %v1340_v38  ;;  %v742_v38 = vand.u32 3, %v741_v18 }
  0x8a   : > { %v410_v40 = vshrl.u32 %v392_v30, %v408_v34  ;;  %v413_v41 = vadd.s32 127, %v412_v37  ;;  %v765_v30 = vld [vmem:[#allocation2 + $0x58] sm:$0xff]  ;;  %v762_v37 = vld [vmem:[#allocation2 + $0x40] sm:$0xff] }
  0x8b   : > { %v1341_v47 = vadd.s32 4294967294, %v507_v44  ;;  %v1399_v44 = vpack.c.bf16 %v760_v25, %v756_v24  ;;  %v1401_v42 = vpack.c.bf16 %v769_v57, %v765_v30  ;;  %vm747_vm12 = vcmp.eq.s32.totalorder %v742_v38, 2 }
  0x8c   : > { %v411_v45 = vor.u32 %v410_v40, %v409_v36  ;;  %v414_v46 = vshll.u32 %v413_v41, 23  ;;  %v1391_v36 = vpack.c.bf16 %v758_v21, %v754_v6  ;;  %vm744_vm13 = vcmp.eq.s32.totalorder %v742_v38, 0 }
  0x8d   : > { %vm1342_vm14 = vcmp.lt.s32.totalorder %v1341_v47, 0 }
  0x8e   : > { %v415_v48 = vor.u32 4788187, %v414_v46  ;;  %v418_v49 = vcvt.s32.f32 %v411_v45  ;;  %v510_v43 = vsel %vm1342_vm14, 0, %v1341_v47  ;;  %v766_v45 = vld [vmem:[#allocation2 + $0x60] sm:$0xff]  ;;  %v764_v46 = vld [vmem:[#allocation2 + $0x50] sm:$0xff] }
  0x8f   : > { %v511_v53 = vsub.s32 32, %v510_v43  ;;  %v512_v52 = vshll.u32 %v503_v29, %v510_v43  ;;  %v515_v54 = vsub.s32 4294967266, %v510_v43  ;;  %v767_v29 = vld [vmem:[#allocation2 + $0x68] sm:$0xff]  ;;  %v768_v47 = vld [vmem:[#allocation2 + $0x70] sm:$0xff] }
  0x90   : > { %v416_v51 = vand.u32 2147483647, %v415_v48  ;;  %v532_v48 = vand.u32 3, %v528_v15 }
  0x91   : > { %v513_v59 = vshrl.u32 %v495_v50, %v511_v53  ;;  %v516_v60 = vadd.s32 127, %v515_v54  ;;  %v1395_v53 = vpack.c.bf16 %v766_v45, %v762_v37 }
  0x92   : > { %v419_v58 = vmul.f32 %v418_v49, %v416_v51  ;;  %v1393_v51 = vpack.c.bf16 %v767_v29, %v763_v26  ;;  %vm534_vm14 = vcmp.eq.s32.totalorder %v532_v48, 0 }
  0x93   : > { %v514_v62 = vor.u32 %v513_v59, %v512_v52  ;;  %v517_v55 = vshll.u32 %v516_v60, 23  ;;  %v1403_v52 = vpack.c.bf16 %v768_v47, %v764_v46  ;;  %v771_v60 = vld [vmem:[#allocation2 + $0x88] sm:$0x1] }
  0x94   : > { %v420_v61 = vxor.u32 2147483648, %v419_v58 }
  0x95   : > { %v518_v3 = vor.u32 4788187, %v517_v55  ;;  %v521_v4 = vcvt.s32.f32 %v514_v62 }
  0x96   : > { %v421_v63 = vsel %vm338_vm15, %v420_v61, %v419_v58  ;;  %vm537_vm15 = vcmp.eq.s32.totalorder %v532_v48, 2  ;;  %v773_v61 = vld [vmem:[#allocation2 + $0x98] sm:$0x1] }
  0x97   : > { %v424_v1 = vsel %vm337_vm1, %v1842_v31, %v421_v63  ;;  %v519_v5 = vand.u32 2147483647, %v518_v3  ;;  %vm743_vm1 = vcmp.lt.s32.totalorder %v742_v38, 2 }
  0x98   : > { %1506 = vcosq.f32 %v424_v1 }
  0x99   : > { %1508 = vsinq.f32 %v424_v1  ;;  %v522_v9 = vmul.f32 %v521_v4, %v519_v5  ;;  %v770_v4 = vld [vmem:[#allocation2 + $0x80] sm:$0x1] }
  0x9b   : > { %v523_v35 = vxor.u32 2147483648, %v522_v9 }
  0x9d   : > { %v524_v13 = vsel %vm441_vm2, %v523_v35, %v522_v9  ;;  %vm531_vm2 = vweird.f32 %v1844_v32 }
  0x9e   : > { %v527_v14 = vsel %vm440_vm3, %v1844_v32, %v524_v13  ;;  %vm533_vm3 = vcmp.lt.s32.totalorder %v532_v48, 2  ;;  %v1162_v13 = vld [vmem:[%s2014_s4] sm:$0xff] }
  0x9f   : > { %1510 = vcosq.f32 %v527_v14  ;;  %v1164_v6 = vrot.slane %v1162_v13, 5 }
  0xa0   : > { %1512 = vsinq.f32 %v527_v14 }
  0xa2   : > { %v1507_v16 = vpop.eup %1506 }
  0xa3   : > { %v1509_v39 = vpop.eup %1508  ;;  %v435_v17 = vxor.u32 2147483648, %v1507_v16 }
  0xa4   : > { %v432_v20 = vxor.u32 2147483648, %v1509_v39 }
  0xa5   : > { %v436_v22 = vsel %vm434_vm4, %v435_v17, %v1509_v39  ;;  %v645_v23 = vsel %vm643_vm5, %v435_v17, %v1509_v39  ;;  %vm1149_vm4 = vcmask 1041408  }
  0xa6   : > { %v433_v27 = vsel %vm431_vm6, %v1507_v16, %v432_v20  ;;  %v642_v28 = vsel %vm640_vm7, %v1507_v16, %v432_v20 }
  0xa7   : > { %v437_v33 = vsel %vm430_vm8, %v433_v27, %v436_v22  ;;  %v646_v34 = vsel %vm639_vm9, %v642_v28, %v645_v23 }
  0xa8   : > { %v438_v40 = vsel %vm428_vm10, nan, %v437_v33  ;;  %v647_v41 = vsel %vm428_vm10, nan, %v646_v34 }
  0xa9   : > { %v542_v49 = vmul.f32 %v438_v40, %v332_v19  ;;  %v752_v50 = vmul.f32 %v647_v41, %v332_v19  ;;  %v1511_v43 = vpop.eup %1510 }
  0xaa   : > { %v1513_v54 = vpop.eup %1512  ;;  %v538_v31 = vxor.u32 2147483648, %v1511_v43 }
  0xab   : > { %1353 = vmatmul.mubr.msk.f32.vlgmr.msra.gmra.mrb[0].mxu0 %vm794_vm11, %v752_v50  ;;  %1357 = vmatmul.mubr.msk.f32.vlgmr.msra.gmra.mrb[0].mxu1 %vm794_vm11, %v752_v50  ;;  %v535_v58 = vxor.u32 2147483648, %v1513_v54 }
  0xac   : > { %1392 = vmatpush1.bf16.msra.mxu0 %v1391_v36  ;;  %1400 = vmatpush1.bf16.msra.mxu1 %v1399_v44  ;;  %v749_v59 = vsel %vm747_vm12, %v538_v31, %v1513_v54  ;;  %v539_v63 = vsel %vm537_vm15, %v538_v31, %v1513_v54 }
  0xad   : > { %1394 = vmatprep.subr.bf16.mxu0 %v1393_v51  ;;  %1402 = vmatprep.subr.bf16.mxu1 %v1401_v42  ;;  %v746_v62 = vsel %vm744_vm13, %v1511_v43, %v535_v58  ;;  %v536_v55 = vsel %vm534_vm14, %v1511_v43, %v535_v58 }
  0xae   : > { %884 = vmatprep.mubr.f32.mxu0 %v1662_v0  ;;  %961 = vmatprep.mubr.f32.mxu1 %v1662_v0  ;;  %v750_v1 = vsel %vm743_vm1, %v746_v62, %v749_v59  ;;  %v540_v5 = vsel %vm533_vm3, %v536_v55, %v539_v63 }
  0xaf   : > { %v751_v2 = vsel %vm531_vm2, nan, %v750_v1  ;;  %v541_v8 = vsel %vm531_vm2, nan, %v540_v5 }
  0xb0   : > { %1396 = vmatpush1.bf16.msra.mxu0 %v1395_v53  ;;  %1404 = vmatpush1.bf16.msra.mxu1 %v1403_v52  ;;  %v753_v3 = vmul.f32 %v751_v2, %v333_v56  ;;  %v543_v9 = vmul.f32 %v541_v8, %v333_v56 }
  0xb1   : > { %1359 = vmatprep.subr.msk.mxu0 %vm801_vm0, %v771_v60  ;;  %1363 = vmatprep.subr.msk.mxu1 %vm801_vm0, %v773_v61 }
  0xb2   : > { %1354 = vmatmul.mubr.msk.f32.gmra.mrb[2].mxu0 %vm794_vm11, %v753_v3  ;;  %1358 = vmatmul.mubr.msk.f32.gmra.mrb[2].mxu1 %vm794_vm11, %v753_v3 }
  0xb3   : > { %1049 = vmatprep.mubr.f32.mxu0 %v1662_v0  ;;  %1126 = vmatprep.mubr.f32.mxu1 %v1662_v0 }
  0xb4   : > { %1360 = vmatpush1.msk.msra.mxu0 %vm801_vm0, %v770_v4  ;;  %1364 = vmatpush1.msk.msra.mxu1 %vm801_vm0, %v772_v7 }
  0xb6   : > { %1361 = vmatmul.mubr.msk.f32.vlgmr.msra.gmra.mrb[0].mxu0 %vm794_vm11, %v542_v49  ;;  %1365 = vmatmul.mubr.msk.f32.vlgmr.msra.gmra.mrb[0].mxu1 %vm794_vm11, %v542_v49 }
  0xb7   : > { %1055 = vmatprep.mubr.f32.mxu0 %v1662_v0  ;;  %1132 = vmatprep.mubr.f32.mxu1 %v1662_v0 }
  0xba   : > { %1362 = vmatmul.mubr.msk.f32.gmra.mrb[2].mxu0 %vm794_vm11, %v543_v9  ;;  %1366 = vmatmul.mubr.msk.f32.gmra.mrb[2].mxu1 %vm794_vm11, %v543_v9 }
 0x189   : > { %v1051_v32 = vpop.f32.mrb[0].mxu0  ;;  %v1128_v35 = vpop.f32.mrb[0].mxu1 }
 0x18a   : > { %v1053_v10 = vpop.f32.mrb[1].mxu0  ;;  %v1130_v11 = vpop.f32.mrb[1].mxu1  ;;  %v1150_v14 = vrot.slane %v1128_v35, 6 }
 0x18b   : > { %v1140_v12 = vrot.slane %v1053_v10, 7  ;;  %v1158_v20 = vrot.slane %v1130_v11, 5 }
 0x18d   : > { %v1145_v15 = vadd.f32 %v1140_v12, %v1051_v32  ;;  %v1057_v16 = vpop.f32.mrb[2].mxu0  ;;  %v1134_v39 = vpop.f32.mrb[2].mxu1 }
 0x18e   : > { %v1151_v0 = vrot.slane %v1134_v39, 6  ;;  %v1059_v17 = vpop.f32.mrb[3].mxu0  ;;  %v1136_v18 = vpop.f32.mrb[3].mxu1 }
 0x18f   : > { %v1155_v19 = vadd.f32 %v1150_v14, %v1145_v15  ;;  %v1141_v21 = vrot.slane %v1059_v17, 7 }
 0x190   : > { %v1152_v22 = vsel %vm1149_vm4, %v1150_v14, %v1151_v0 }
 0x191   : > { %v1160_v23 = vadd.f32 %v1158_v20, %v1155_v19  ;;  %v1142_v24 = vsel %vm801_vm0, %v1140_v12, %v1141_v21 }
 0x192   : > { %v1146_v25 = vadd.f32 %v1142_v24, %v1057_v16 }
 0x193   : > { %v1166_v26 = vmul.f32 %v1164_v6, %v1160_v23 }
 0x194   : > { %v1156_v27 = vadd.f32 %v1152_v22, %v1146_v25 }
 0x195   : > { %1168 = vst [vmem:[%s309_s29 - $0x3] sm:$0xf8] %v1166_v26 }
 0x196   : > { %v1161_v28 = vadd.f32 %v1158_v20, %v1156_v27 }
 0x198   : > { %v1167_v29 = vmul.f32 %v1164_v6, %v1161_v28 }
 0x19a   : > { %1169 = vst [vmem:[%s309_s29 + $0x5] sm:$0x7] %v1167_v29 }
 0x19b   : > { %1583 = shalt.err (!%p1580_p6)
}
 0x19c   : > { %s1584_s15 = scalar_lea.hbm %s1963_s8, 128  ;;  %s1588_s24 = scalar_lea.hbm %s2015_s5, 256 }
 0x19d   : > { %p1585_p7 = scmp.ne.s32.totalorder %s1963_s8, %s1584_s15  ;;  %p1589_p0 = scmp.lt.u32.totalorder %s1963_s8, %s2015_s5 }
 0x19e   : > { %p1590_p4 = scmp.lt.u32.totalorder %s1588_s24, %s1584_s15  ;;  %p1592_p1 = scmp.lt.u32.totalorder %s1584_s15, %s1963_s8 }
 0x19f   : > { %p1586_p9 = pnand %p1585_p7, %p2029_p8 }
 0x1a0   : > { %p1591_p13 = por %p1590_p4, %p1589_p0 }
 0x1a1   : > { %p1587_p12 = pneg %p1586_p9 }
 0x1a2   : > { %p1593_p10 = por %p1592_p1, %p1591_p13 }
 0x1a4   : > { %p1594_p11 = pnand %p1593_p10, %p1587_p12 }
 0x1a6   : > { %1597 = shalt.err (!%p1594_p11)
}
 0x1a7   : > { %1429 = dma.vmem_to_hbm [thread:$0]  (%p2029_p8), %s1965_s26, 128, %s1963_s8, %s1171_s11  }
 0x1a8 PF: > { %p1446_p2 = scmp.ge.s32.totalorder %s1656_s23, 2  ;;  %s1197_s29 = sand.u32 1, %s1636_s18  }
 0x1a9   : > { %p2030_p3 = scmp.ne.s32.totalorder %s2023_s30, 0  ;;  %s1198_s10 = scalar_lea.sflag [#allocation4], %s1197_s29 }
 0x1ab   : > { %p1439_p5 = pnand %p1446_p2, %p2030_p3 }
 0x1ad   : > { %1631 = dma.done.wait (!%p1439_p5), %s1198_s10, 128  }
 0x1ae   : > { %1633 = vsyncadd (!%p1439_p5), %s1198_s10, 4294967168  ;;  %s20_s23 = sadd.s32 1, %s1656_s23   ;;  %s2031_s28 = sld [smem:[#allocation11_spill]] }
 0x1af   : > { %p17_p6 = scmp.ge.s32.totalorder %s20_s23, 4   ;;  %s2032_s18 = smov %s1640_s19 }
 0x1b0   : > { %s2033_s19 = smov %s1644_s20  ;;  %s2034_s20 = smov %s1753_s6 }
 0x1b1   : > { %s2035_s21 = smov %s1652_s22  ;;  %19 = sbr.rel (!%p17_p6) target bundleno = 6 (0x6), region = 90 }
 0x1b4   : > { %s2036_s22 = smov %s2031_s28 }
 0x1b8   :  { %1203 = vsyncpa [#allocation3], 1 }
 0x1b9   :  { %1205 = vsyncpa [#allocation3 + $0x1], 1 }
 0x1ba   :  { %1206 = vsyncpa [#allocation6], 1 }
 0x1bb   :  { %1207 = vsyncpa [#allocation4], 1 }
 0x1bc   :  { %1209 = vsyncpa [#allocation4 + $0x1], 1 }

// kernel: tpu_custom_call.1
= control target key start
LH: loop header
LB: loop body
LE: loop exit
PB: predicated region body
PF: predicated region fallthrough
CT: control target
= control target key end

     0   :  { %10 = vsyncpa [#allocation3], 0  ;;  %s2010_s0 = inlined_call_operand.vmem [shape: f32[2,1,11,33], index: 0, kind: input, shape index: {}]   ;;  %s2011_s1 = inlined_call_operand.vmem [shape: f32[2,1,11,33], index: 1, kind: input, shape index: {}]   ;;  %s2012_s2 = inlined_call_operand.hbm [shape: f32[33,512], index: 2, kind: input, shape index: {}]   ;;  %s2013_s3 = inlined_call_operand.hbm [shape: f32[33,512], index: 3, kind: input, shape index: {}]   ;;  %s2014_s4 = inlined_call_operand.vmem [shape: f32[8,128], index: 4, kind: input, shape index: {}]   ;;  %s2015_s5 = inlined_call_operand.hbm [shape: f32[2,8,128], index: 5, kind: output, shape index: {}]  }
   0x1   :  { %11 = vsyncpa [#allocation6], 0 }
   0x2   :  { %12 = vsyncpa [#allocation4], 0 }
   0x3   :  { %14 = vsyncpa [#allocation4 + $0x1], 0  ;;  %s1700_s18 = smov 0   ;;  %s1702_s19 = smov 0  }
   0x4   :  { %s1704_s20 = smov 0   ;;  %s1706_s21 = smov 0  }
   0x5   :  { %s1708_s22 = smov 0   ;;  %s1710_s23 = smov 0  }
   0x6 LB: > { %s1320_s24 = sadd.s32 4294967295, %s1656_s23   ;;  %s1321_s25 = sadd.s32 4294967294, %s1656_s23   ;;  %s1656_s23 = sphi %s1710_s23, %s20_s23   ;;  %s1652_s22 = sphi %s1708_s22, %s2036_s22   ;;  %s1648_s21 = sphi %s1706_s21, %s2035_s21   ;;  %s1644_s20 = sphi %s1704_s20, %s2034_s20   ;;  %s1640_s19 = sphi %s1702_s19, %s2033_s19   ;;  %s1636_s18 = sphi %s1700_s18, %s2032_s18  }
   0x7   : > { %s32_s26 = sadd.s32 1, %s1652_s22  ;;  %s165_s27 = sadd.s32 1, %s1644_s20 }
   0x8   : > { %p34_p0 = scmp.ge.s32.totalorder %s32_s26, 2  ;;  %p175_p1 = scmp.ne.s32.totalorder %s1644_s20, %s1640_s19 }
   0x9   : > { %p176_p2 = scmp.eq.s32.totalorder %s1320_s24, 1  ;;  %p181_p3 = scmp.ne.s32.totalorder %s1640_s19, %s1636_s18 }
   0xa   : > { %s2038_s26 = smov (%p34_p0, %s32_s26), 0  ;;  %p182_p5 = scmp.eq.s32.totalorder %s1321_s25, 1 }
   0xb   : > { %2021 = sst [smem:[#allocation11_spill]] %s2038_s26  ;;  %p1740_p4 = por %p176_p2, %p175_p1 }
   0xc   : > { %s160_s29 = ssub.s32 %s1652_s22, %s2038_s26  ;;  %p1322_p6 = scmp.ge.s32.totalorder %s1656_s23, 1 }
   0xd   : > { %s2022_s28 = scalar_select %p1740_p4, 1, 0 }
   0xe   : > { %p163_p7 = scmp.eq.s32.totalorder %s160_s29, 0  ;;  %p1747_p8 = por %p182_p5, %p181_p3 }
   0xf   : > { %p189_p9 = scmp.lt.s32.totalorder %s1656_s23, 3  ;;  %p1759_p11 = scmp.eq.s32.totalorder %s1320_s24, 0 }
  0x10   : > { %s2023_s30 = scalar_select %p1747_p8, 1, 0 }
  0x11   : > { %s1753_s6 = scalar_select %p163_p7, %s1644_s20, %s165_s27  }
  0x12   : > { %p1755_p10 = pnand %p1322_p6, %p189_p9  ;;  %s1658_s9 = smov [#allocation2]  }
  0x13   : > { %s2025_s8 = scalar_select %p1759_p11, 1, 0 }
  0x14   : > { %s2024_s7 = scalar_select %p1755_p10, 1, 0 }
  0x15   : > { %p1431_p12 = pneg %p1755_p10  ;;  %s201_s10 = sshll.u32 %s1658_s9, 4  ;;  %s202_s10 = int_to_ptr.vmem [resolvable:$true] %s201_s10 }
  0x16   : > { %s1659_s12 = smov [#allocation5]   ;;  %s1514_s16 = scalar_lea.hbm %s2012_s2, 2560 }
  0x17   : > { %p1767_p13 = pnand %p1759_p11, %p1431_p12  ;;  %s214_s13 = sshll.u32 %s1659_s12, 4  ;;  %s1771_s13 = int_to_ptr.vmem [resolvable:$true] %s214_s13 }
  0x18   : > { %p1515_p0 = scmp.ne.s32.totalorder %s2012_s2, %s1514_s16  ;;  %p1521_p5 = scmp.lt.u32.totalorder %s1514_s16, %s2012_s2 }
  0x19   : > { %p1516_p1 = pneg %p1767_p13 }
  0x1b   : > { %p1517_p2 = pnand %p1516_p1, %p1515_p0 }
  0x1d   : > { %p1518_p3 = pneg %p1517_p2 }
  0x1f   : > { %p1523_p6 = pnand %p1521_p5, %p1518_p3 }
  0x21   : > { %1526 = shalt.err (!%p1523_p6)
}
  0x22   : > { %s1527_s29 = scalar_lea.vmem %s202_s10, 2560  ;;  %p1535_p8 = scmp.lt.s32.totalorder %s202_s10, %s202_s10 }
  0x23   : > { %p1528_p7 = scmp.ne.s32.totalorder %s202_s10, %s1527_s29  ;;  %p1536_p4 = scmp.lt.s32.totalorder %s1527_s29, %s1527_s29 }
  0x25   : > { %p1530_p9 = pnand %p1528_p7, %p1516_p1  ;;  %p1537_p11 = por %p1536_p4, %p1535_p8 }
  0x27   : > { %p1531_p12 = pneg %p1530_p9 }
  0x29   : > { %p1538_p10 = pnand %p1537_p11, %p1531_p12 }
  0x2b   : > { %1541 = shalt.err (!%p1538_p10)
}
  0x2c   : > { %s1660_s9 = smov 512   ;;  %s1661_s12 = smov 32  }
  0x2d   : > { %1434 = dma.hbm_to_vmem [thread:$0]  (!%p1767_p13), %s2012_s2, 2560, %s202_s10, [#allocation3], %s1660_s9, %s1660_s9, %s1661_s12  }
  0x2e   : > { %s1542_s24 = scalar_lea.hbm %s2013_s3, 2560 }
  0x2f   : > { %p1543_p0 = scmp.ne.s32.totalorder %s2013_s3, %s1542_s24  ;;  %p1549_p10 = scmp.lt.u32.totalorder %s1542_s24, %s2013_s3 }
  0x31   : > { %p1545_p4 = pnand %p1543_p0, %p1516_p1 }
  0x33   : > { %p1546_p8 = pneg %p1545_p4 }
  0x35   : > { %p1551_p11 = pnand %p1549_p10, %p1546_p8 }
  0x37   : > { %1554 = shalt.err (!%p1551_p11)
}
  0x38   : > { %s1555_s10 = scalar_lea.vmem %s1771_s13, 2560  ;;  %p1563_p6 = scmp.lt.s32.totalorder %s1771_s13, %s1771_s13 }
  0x39   : > { %p1556_p2 = scmp.ne.s32.totalorder %s1771_s13, %s1555_s10  ;;  %p1564_p7 = scmp.lt.s32.totalorder %s1555_s10, %s1555_s10 }
  0x3b   : > { %p1558_p3 = pnand %p1556_p2, %p1516_p1  ;;  %p1565_p9 = por %p1564_p7, %p1563_p6 }
  0x3d   : > { %p1559_p5 = pneg %p1558_p3 }
  0x3f   : > { %p1566_p12 = pnand %p1565_p9, %p1559_p5 }
  0x41   : > { %1569 = shalt.err (!%p1566_p12)
}
  0x42   : > { %1437 = dma.hbm_to_vmem [thread:$0]  (!%p1767_p13), %s2013_s3, 2560, %s1771_s13, [#allocation6], %s1660_s9, %s1660_s9, %s1661_s12  }
  0x43   : > { %p2027_p0 = scmp.ne.s32.totalorder %s2024_s7, 0 }
  0x44   : > { %p2028_p4 = scmp.ne.s32.totalorder (!%p2027_p0), %s2025_s8, 0 }
  0x45   : > { %261 = sbr.rel (%p2027_p0) target bundleno = 424 (0x1a8), region = 40 }
  0x4c   : > { %1623 = dma.done.wait (%p2028_p4), [#allocation3], 2560  }
  0x4d   : > { %1625 = vsyncadd (%p2028_p4), [#allocation3], 4294964736 }
  0x4e   : > { %1627 = dma.done.wait (%p2028_p4), [#allocation6], 2560  }
  0x4f   : > { %1629 = vsyncadd (%p2028_p4), [#allocation6], 4294964736  ;;  %v1662_v0 = vmov 0.0   ;;  %p310_p13 = scmp.lt.s32.totalorder %s1648_s21, 1  ;;  %v775_v1 = vld [vmem:[#allocation5 + $0x8] sm:$0xff]  ;;  %v777_v3 = vld [vmem:[#allocation5 + $0x18] sm:$0xff] }
  0x50   : > { %878 = vmatprep.mubr.f32.mxu0 %v1662_v0  ;;  %955 = vmatprep.mubr.f32.mxu1 %v1662_v0  ;;  %v779_v2 = vld [vmem:[#allocation5 + $0x28] sm:$0xff]  ;;  %v781_v5 = vld [vmem:[#allocation5 + $0x38] sm:$0xff]  ;;  %v774_v6 = vld [vmem:[#allocation5] sm:$0xff]  ;;  %vm801_vm0 = vcmask 1040384   ;;  %v1663_v59 = vmov 683565275  }
  0x51   : > { %s1834_s7 = scalar_select %p310_p13, %s1648_s21, 1  ;;  %v1373_v4 = vpack.c.bf16 %v779_v2, %v775_v1  ;;  %v778_v7 = vld [vmem:[#allocation5 + $0x20] sm:$0xff]  ;;  %v1381_v8 = vpack.c.bf16 %v781_v5, %v777_v3  ;;  %v776_v10 = vld [vmem:[#allocation5 + $0x10] sm:$0xff]  ;;  %v783_v12 = vld [vmem:[#allocation5 + $0x48] sm:$0xff]  ;;  %v1664_v61 = vmov 2475754826  }
  0x52   : > { %v1375_v9 = vpack.c.bf16 %v778_v7, %v774_v6  ;;  %v780_v11 = vld [vmem:[#allocation5 + $0x30] sm:$0xff]  ;;  %v787_v14 = vld [vmem:[#allocation5 + $0x68] sm:$0xff]  ;;  %v785_v15 = vld [vmem:[#allocation5 + $0x58] sm:$0xff]  ;;  %v1665_v63 = vmov 2131351028   ;;  %s307_s25 = sand.u32 1, %s1640_s19  }
  0x53   : > { %s1371_s8 = sshll.u32 %s1834_s7, 4  ;;  %1374 = vmatprep.subr.bf16.mxu0 %v1373_v4  ;;  %v1383_v13 = vpack.c.bf16 %v780_v11, %v776_v10  ;;  %v789_v16 = vld [vmem:[#allocation5 + $0x78] sm:$0xff]  ;;  %1382 = vmatprep.subr.bf16.mxu1 %v1381_v8  ;;  %v1377_v17 = vpack.c.bf16 %v787_v14, %v783_v12  ;;  %v782_v19 = vld [vmem:[#allocation5 + $0x40] sm:$0xff]  ;;  %v784_v21 = vld [vmem:[#allocation5 + $0x50] sm:$0xff]  ;;  %v1666_v2 = vmov 2102212464  }
  0x54   : > { %1376 = vmatpush1.bf16.msra.mxu0 %v1375_v9  ;;  %v1385_v18 = vpack.c.bf16 %v789_v16, %v785_v15  ;;  %v786_v20 = vld [vmem:[#allocation5 + $0x60] sm:$0xff]  ;;  %v788_v23 = vld [vmem:[#allocation5 + $0x70] sm:$0xff]  ;;  %s327_s9 = scalar_lea.vmem %s2011_s1, %s1371_s8  ;;  %v791_v25 = vld [vmem:[#allocation5 + $0x88] sm:$0x1]  ;;  %v1667_v4 = vmov 920167782   ;;  %s1919_s16 = scalar_lea.vmem %s2010_s0, %s1371_s8 }
  0x55   : > { %1384 = vmatpush1.bf16.msra.mxu1 %v1383_v13  ;;  %v1379_v22 = vpack.c.bf16 %v786_v20, %v782_v19  ;;  %1378 = vmatprep.subr.bf16.mxu0 %v1377_v17  ;;  %v1387_v24 = vpack.c.bf16 %v788_v23, %v784_v21  ;;  %v793_v26 = vld [vmem:[#allocation5 + $0x98] sm:$0x1]  ;;  %v755_v27 = vld [vmem:[#allocation2 + $0x8] sm:$0xff]  ;;  %v1842_v31 = vld [vmem:[%s327_s9] sm:$0xff]  ;;  %v1668_v12 = vmov 1326507024  }
  0x56   : > { %1386 = vmatprep.subr.bf16.mxu1 %v1385_v18  ;;  %v759_v28 = vld [vmem:[#allocation2 + $0x28] sm:$0xff]  ;;  %v757_v29 = vld [vmem:[#allocation2 + $0x18] sm:$0xff]  ;;  %v790_v33 = vld [vmem:[#allocation5 + $0x80] sm:$0x1]  ;;  %v336_v35 = vand.u32 2147483647, %v1842_v31 }
  0x57   : > { %v761_v30 = vld [vmem:[#allocation2 + $0x38] sm:$0xff]  ;;  %v1844_v32 = vld [vmem:[%s327_s9 + $0x8] sm:$0x7]  ;;  %v1389_v34 = vpack.c.bf16 %v759_v28, %v755_v27  ;;  %v339_v36 = vand.u32 2139095040, %v1842_v31  ;;  %v792_v37 = vld [vmem:[#allocation5 + $0x90] sm:$0x1] }
  0x58   : > { %1380 = vmatpush1.bf16.msra.mxu0 %v1379_v22  ;;  %v1397_v38 = vpack.c.bf16 %v761_v30, %v757_v29  ;;  %v439_v39 = vand.u32 2147483647, %v1844_v32  ;;  %v442_v40 = vand.u32 2139095040, %v1844_v32  ;;  %v343_v42 = vand.u32 8388607, %v336_v35  ;;  %s1330_s27 = sshll.u32 %s307_s25, 3 }
  0x59   : > { %1388 = vmatpush1.bf16.msra.mxu1 %v1387_v24  ;;  %1351 = vmatprep.subr.msk.mxu0 %vm801_vm0, %v791_v25  ;;  %v340_v41 = vshrl.u32 %v339_v36, 23  ;;  %vm338_vm15 = vcmp.lt.s32.totalorder %v1842_v31, 0  ;;  %s309_s29 = scalar_lea.vmem [#allocation7], %s1330_s27  ;;  %s1368_s10 = sshll.u32 %s1648_s21, 7 }
  0x5a   : > { %1355 = vmatprep.subr.msk.mxu1 %vm801_vm0, %v793_v26  ;;  %v443_v43 = vshrl.u32 %v442_v40, 23  ;;  %v446_v44 = vand.u32 8388607, %v439_v39  ;;  %v344_v48 = vor.u32 8388608, %v343_v42  ;;  %s1185_s26 = sshll.u32 %s309_s29, 4  ;;  %s1963_s8 = scalar_lea.hbm %s2015_s5, %s1368_s10  ;;  %s1965_s26 = int_to_ptr.vmem [resolvable:$true] %s1185_s26 }
  0x5b   : > { %v1335_v45 = vadd.s32 4294967169, %v340_v41  ;;  %s1171_s11 = scalar_lea.sflag [#allocation4], %s307_s25  ;;  %s1570_s13 = scalar_lea.vmem %s1965_s26, 128 }
  0x5c   : > { %1352 = vmatpush1.msk.msra.mxu0 %vm801_vm0, %v790_v33  ;;  %v1339_v46 = vadd.s32 4294967169, %v443_v43  ;;  %v447_v49 = vor.u32 8388608, %v446_v44  ;;  %v1858_v55 = vshll.u32 %v344_v48, 8  ;;  %p1571_p1 = scmp.ne.s32.totalorder %s1965_s26, %s1570_s13  ;;  %p2029_p8 = scmp.ne.s32.totalorder %s2022_s28, 0 }
  0x5d   : > { %1356 = vmatpush1.msk.msra.mxu1 %vm801_vm0, %v792_v37  ;;  %1390 = vmatprep.subr.bf16.mxu0 %v1389_v34  ;;  %v346_v47 = vadd.s32 1, %v1335_v45  ;;  %s1669_s21 = smov [#allocation7]  }
  0x5e   : > { %1398 = vmatprep.subr.bf16.mxu1 %v1397_v38  ;;  %v449_v50 = vadd.s32 1, %v1339_v46  ;;  %v1860_v57 = vshll.u32 %v447_v49, 8  ;;  %p1572_p10 = pnand %p1571_p1, %p2029_p8  ;;  %s1574_s9 = sshll.u32 %s1669_s21, 4  ;;  %s1575_s9 = int_to_ptr.vmem [resolvable:$false] %s1574_s9 }
  0x5f   : > { %vm347_vm1 = vcmp.gt.s32.totalorder %v346_v47, 0  ;;  %s1576_s12 = scalar_lea.vmem %s1575_s9, 256  ;;  %p1577_p2 = scmp.lt.s32.totalorder %s1965_s26, %s1575_s9 }
  0x60   : > { %v348_v51 = vsel %vm347_vm1, %v346_v47, 0  ;;  %vm450_vm2 = vcmp.gt.s32.totalorder %v449_v50, 0  ;;  %vm337_vm1 = vcmp.le.f32.partialorder %v336_v35, 0.7853982  ;;  %p1573_p11 = pneg %p1572_p10  ;;  %p1578_p3 = scmp.lt.s32.totalorder %s1576_s12, %s1570_s13 }
  0x61   : > { %v349_v52 = vshrl.u32 %v348_v51, 5  ;;  %v350_v53 = vand.u32 31, %v348_v51  ;;  %v451_v54 = vsel %vm450_vm2, %v449_v50, 0  ;;  %vm441_vm2 = vcmp.lt.s32.totalorder %v1844_v32, 0 }
  0x62   : > { %v453_v56 = vand.u32 31, %v451_v54  ;;  %v1862_v6 = vshrl.u32 %v451_v54, 5  ;;  %p1579_p5 = por %p1578_p3, %p1577_p2 }
  0x63   : > { %v351_v58 = vsub.s32 32, %v350_v53  ;;  %v353_v60 = vshll.u32 %v1663_v59, %v350_v53  ;;  %v356_v62 = vshll.u32 %v1664_v61, %v350_v53  ;;  %v359_v1 = vshll.u32 %v1665_v63, %v350_v53 }
  0x64   : > { %v362_v3 = vshll.u32 %v1666_v2, %v350_v53  ;;  %v365_v5 = vshll.u32 %v1667_v4, %v350_v53  ;;  %vm368_vm3 = vcmp.lt.s32.totalorder %v349_v52, 1  ;;  %vm369_vm4 = vcmp.lt.s32.totalorder %v349_v52, 2  ;;  %p1580_p6 = pnand %p1579_p5, %p1573_p11 }
  0x65   : > { %v352_v7 = vshrl.u32 %v1663_v59, %v351_v58  ;;  %v354_v8 = vshrl.u32 %v1664_v61, %v351_v58  ;;  %v357_v9 = vshrl.u32 %v1665_v63, %v351_v58  ;;  %v360_v10 = vshrl.u32 %v1666_v2, %v351_v58 }
  0x66   : > { %v363_v11 = vshrl.u32 %v1667_v4, %v351_v58  ;;  %v366_v13 = vshrl.u32 %v1668_v12, %v351_v58  ;;  %vm371_vm5 = vcmp.lt.s32.totalorder %v349_v52, 4  ;;  %v454_v17 = vsub.s32 32, %v453_v56 }
  0x67   : > { %v355_v14 = vor.u32 %v354_v8, %v353_v60  ;;  %v358_v15 = vor.u32 %v357_v9, %v356_v62  ;;  %v361_v16 = vor.u32 %v360_v10, %v359_v1  ;;  %vm370_vm6 = vcmp.lt.s32.totalorder %v349_v52, 3 }
  0x68   : > { %v364_v18 = vor.u32 %v363_v11, %v362_v3  ;;  %v367_v19 = vor.u32 %v366_v13, %v365_v5  ;;  %v456_v20 = vshll.u32 %v1663_v59, %v453_v56  ;;  %v459_v28 = vshll.u32 %v1664_v61, %v453_v56 }
  0x69   : > { %v372_v21 = vsel %vm368_vm3, %v352_v7, %v355_v14  ;;  %v373_v22 = vsel %vm371_vm5, %v361_v16, 2102212464  ;;  %v376_v23 = vsel %vm368_vm3, %v355_v14, %v358_v15  ;;  %v380_v24 = vsel %vm368_vm3, %v358_v15, %v361_v16 }
  0x6a   : > { %v374_v25 = vsel %vm370_vm6, %v358_v15, %v373_v22  ;;  %v377_v26 = vsel %vm371_vm5, %v364_v18, 920167782  ;;  %v381_v27 = vsel %vm371_vm5, %v367_v19, 1326507024  ;;  %v455_v33 = vshrl.u32 %v1663_v59, %v454_v17 }
  0x6b   : > { %v378_v29 = vsel %vm370_vm6, %v361_v16, %v377_v26  ;;  %v382_v30 = vsel %vm370_vm6, %v364_v18, %v381_v27  ;;  %v457_v34 = vshrl.u32 %v1664_v61, %v454_v17  ;;  %v375_v36 = vsel %vm369_vm4, %v372_v21, %v374_v25 }
  0x6c   : > { %v379_v37 = vsel %vm369_vm4, %v376_v23, %v378_v29  ;;  %v383_v38 = vsel %vm369_vm4, %v380_v24, %v382_v30  ;;  %v460_v40 = vshrl.u32 %v1665_v63, %v454_v17  ;;  %v462_v47 = vshll.u32 %v1665_v63, %v453_v56 }
  0x6d   : > { %v1871_v41 = vmul.u32.u64.low %v1858_v55, %v383_v38  ;;  %v1872_v42 = vmul.u32.u64.high %v1858_v55, %v383_v38, %v1871_v41  ;;  %v1875_v43 = vmul.u32.u64.low %v1858_v55, %v379_v37  ;;  %v1876_v44 = vmul.u32.u64.high %v1858_v55, %v379_v37, %v1875_v43 }
  0x6e   : > { %v458_v45 = vor.u32 %v457_v34, %v456_v20  ;;  %v461_v46 = vor.u32 %v460_v40, %v459_v28  ;;  %v463_v48 = vshrl.u32 %v1666_v2, %v454_v17  ;;  %v465_v49 = vshll.u32 %v1666_v2, %v453_v56 }
  0x6f   : > { %v466_v50 = vshrl.u32 %v1667_v4, %v454_v17  ;;  %v468_v51 = vshll.u32 %v1667_v4, %v453_v56  ;;  %v469_v53 = vshrl.u32 %v1668_v12, %v454_v17  ;;  %v391_v52 = vmul.u32 %v1858_v55, %v375_v36 }
  0x70   : > { %v464_v54 = vor.u32 %v463_v48, %v462_v47  ;;  %vm471_vm7 = vcmp.lt.s32.totalorder %v1862_v6, 1  ;;  %vm472_vm8 = vcmp.lt.s32.totalorder %v1862_v6, 2  ;;  %vm393_vm9 = vc.u32 %v1872_v42, %v1875_v43 }
  0x71   : > { %v394_v58 = vadd.s32 1, %v1876_v44  ;;  %v467_v59 = vor.u32 %v466_v50, %v465_v49  ;;  %vm473_vm10 = vcmp.lt.s32.totalorder %v1862_v6, 3  ;;  %v470_v60 = vor.u32 %v469_v53, %v468_v51 }
  0x72   : > { %vm474_vm11 = vcmp.lt.s32.totalorder %v1862_v6, 4  ;;  %v475_v61 = vsel %vm471_vm7, %v455_v33, %v458_v45  ;;  %v479_v56 = vsel %vm471_vm7, %v458_v45, %v461_v46  ;;  %v483_v1 = vsel %vm471_vm7, %v461_v46, %v464_v54 }
  0x73   : > { %v395_v62 = vsel %vm393_vm9, %v394_v58, %v1876_v44  ;;  %v476_v55 = vsel %vm474_vm11, %v464_v54, 2102212464  ;;  %v480_v63 = vsel %vm474_vm11, %v467_v59, 920167782  ;;  %v484_v5 = vsel %vm474_vm11, %v470_v60, 1326507024 }
  0x74   : > { %v396_v2 = vadd.s32 %v395_v62, %v391_v52  ;;  %v477_v3 = vsel %vm473_vm10, %v461_v46, %v476_v55  ;;  %v481_v4 = vsel %vm473_vm10, %v464_v54, %v480_v63  ;;  %v485_v9 = vsel %vm473_vm10, %v467_v59, %v484_v5 }
  0x75   : > { %v478_v7 = vsel %vm472_vm8, %v475_v61, %v477_v3  ;;  %v482_v8 = vsel %vm472_vm8, %v479_v56, %v481_v4  ;;  %v486_v11 = vsel %vm472_vm8, %v483_v1, %v485_v9  ;;  %v392_v30 = vadd.s32 %v1875_v43, %v1872_v42 }
  0x76   : > { %v397_v10 = vadd.s32 536870912, %v396_v2  ;;  %v1893_v12 = vmul.u32.u64.low %v1860_v57, %v482_v8  ;;  %v1894_v13 = vmul.u32.u64.high %v1860_v57, %v482_v8, %v1893_v12  ;;  %v494_v17 = vmul.u32 %v1860_v57, %v478_v7 }
  0x77   : > { %v1897_v14 = vmul.u32.u64.low %v1860_v57, %v486_v11  ;;  %v1898_v15 = vmul.u32.u64.high %v1860_v57, %v486_v11, %v1897_v14  ;;  %vm440_vm3 = vcmp.le.f32.partialorder %v439_v39, 0.7853982  ;;  %vm428_vm10 = vweird.f32 %v1842_v31 }
  0x78   : > { %v398_v16 = vshrl.u32 %v397_v10, 30  ;;  %v497_v19 = vadd.s32 1, %v1894_v13  ;;  %vm794_vm11 = vcmask 269312  }
  0x79   : > { %vm496_vm12 = vc.u32 %v1898_v15, %v1893_v12  ;;  %v495_v50 = vadd.s32 %v1893_v12, %v1898_v15 }
  0x7a   : > { %v399_v18 = vshll.u32 %v398_v16, 30  ;;  %v498_v6 = vsel %vm496_vm12, %v497_v19, %v1894_v13  ;;  %v422_v42 = vsub.s32 4, %v398_v16  ;;  %v332_v19 = vld [vmem:[%s1919_s16] sm:$0xff] }
  0x7b   : > { %v499_v21 = vadd.s32 %v498_v6, %v494_v17  ;;  %v754_v6 = vld [vmem:[#allocation2] sm:$0xff] }
  0x7c   : > { %v400_v20 = vsub.s32 %v396_v2, %v399_v18  ;;  %v423_v56 = vsel %vm338_vm15, %v422_v42, %v398_v16 }
  0x7d   : > { %v500_v23 = vadd.s32 536870912, %v499_v21  ;;  %v425_v2 = vsel %vm337_vm1, 0, %v423_v56  ;;  %v333_v56 = vld [vmem:[%s1919_s16 + $0x8] sm:$0x7] }
  0x7e   : > { %v402_v22 = vsub.s32 0, %v400_v20  ;;  %v637_v8 = vadd.s32 3, %v425_v2  ;;  %v429_v11 = vand.u32 3, %v425_v2 }
  0x7f   : > { %v501_v25 = vshrl.u32 %v500_v23, 30 }
  0x80   : > { %v1336_v24 = vmin.u32 %v402_v22, %v400_v20  ;;  %v638_v12 = vand.u32 3, %v637_v8  ;;  %vm434_vm4 = vcmp.eq.s32.totalorder %v429_v11, 2  ;;  %vm431_vm6 = vcmp.eq.s32.totalorder %v429_v11, 0 }
  0x81   : > { %v502_v27 = vshll.u32 %v501_v25, 30  ;;  %v525_v7 = vsub.s32 4, %v501_v25  ;;  %vm430_vm8 = vcmp.lt.s32.totalorder %v429_v11, 2 }
  0x82   : > { %v404_v26 = vclz %v1336_v24  ;;  %vm643_vm5 = vcmp.eq.s32.totalorder %v638_v12, 2  ;;  %vm640_vm7 = vcmp.eq.s32.totalorder %v638_v12, 0  ;;  %vm639_vm9 = vcmp.lt.s32.totalorder %v638_v12, 2  ;;  %v756_v24 = vld [vmem:[#allocation2 + $0x10] sm:$0xff] }
  0x83   : > { %v503_v29 = vsub.s32 %v499_v21, %v502_v27  ;;  %v526_v10 = vsel %vm441_vm2, %v525_v7, %v501_v25  ;;  %v758_v21 = vld [vmem:[#allocation2 + $0x20] sm:$0xff]  ;;  %v760_v25 = vld [vmem:[#allocation2 + $0x30] sm:$0xff] }
  0x84   : > { %v1337_v28 = vadd.s32 4294967294, %v404_v26  ;;  %v528_v15 = vsel %vm440_vm3, 0, %v526_v10  ;;  %v763_v26 = vld [vmem:[#allocation2 + $0x48] sm:$0xff]  ;;  %v772_v7 = vld [vmem:[#allocation2 + $0x90] sm:$0x1] }
  0x85   : > { %v505_v33 = vsub.s32 0, %v503_v29  ;;  %v741_v18 = vadd.s32 3, %v528_v15 }
  0x86   : > { %vm1338_vm13 = vcmp.lt.s32.totalorder %v1337_v28, 0 }
  0x87   : > { %v407_v57 = vsel %vm1338_vm13, 0, %v1337_v28  ;;  %v1340_v38 = vmin.u32 %v505_v33, %v503_v29 }
  0x88   : > { %v408_v34 = vsub.s32 32, %v407_v57  ;;  %v409_v36 = vshll.u32 %v400_v20, %v407_v57  ;;  %v412_v37 = vsub.s32 4294967266, %v407_v57  ;;  %v769_v57 = vld [vmem:[#allocation2 + $0x78] sm:$0xff] }
  0x89   : > { %v507_v44 = vclz %v1340_v38  ;;  %v742_v38 = vand.u32 3, %v741_v18 }
  0x8a   : > { %v410_v40 = vshrl.u32 %v392_v30, %v408_v34  ;;  %v413_v41 = vadd.s32 127, %v412_v37  ;;  %v765_v30 = vld [vmem:[#allocation2 + $0x58] sm:$0xff]  ;;  %v762_v37 = vld [vmem:[#allocation2 + $0x40] sm:$0xff] }
  0x8b   : > { %v1341_v47 = vadd.s32 4294967294, %v507_v44  ;;  %v1399_v44 = vpack.c.bf16 %v760_v25, %v756_v24  ;;  %v1401_v42 = vpack.c.bf16 %v769_v57, %v765_v30  ;;  %vm747_vm12 = vcmp.eq.s32.totalorder %v742_v38, 2 }
  0x8c   : > { %v411_v45 = vor.u32 %v410_v40, %v409_v36  ;;  %v414_v46 = vshll.u32 %v413_v41, 23  ;;  %v1391_v36 = vpack.c.bf16 %v758_v21, %v754_v6  ;;  %vm744_vm13 = vcmp.eq.s32.totalorder %v742_v38, 0 }
  0x8d   : > { %vm1342_vm14 = vcmp.lt.s32.totalorder %v1341_v47, 0 }
  0x8e   : > { %v415_v48 = vor.u32 4788187, %v414_v46  ;;  %v418_v49 = vcvt.s32.f32 %v411_v45  ;;  %v510_v43 = vsel %vm1342_vm14, 0, %v1341_v47  ;;  %v766_v45 = vld [vmem:[#allocation2 + $0x60] sm:$0xff]  ;;  %v764_v46 = vld [vmem:[#allocation2 + $0x50] sm:$0xff] }
  0x8f   : > { %v511_v53 = vsub.s32 32, %v510_v43  ;;  %v512_v52 = vshll.u32 %v503_v29, %v510_v43  ;;  %v515_v54 = vsub.s32 4294967266, %v510_v43  ;;  %v767_v29 = vld [vmem:[#allocation2 + $0x68] sm:$0xff]  ;;  %v768_v47 = vld [vmem:[#allocation2 + $0x70] sm:$0xff] }
  0x90   : > { %v416_v51 = vand.u32 2147483647, %v415_v48  ;;  %v532_v48 = vand.u32 3, %v528_v15 }
  0x91   : > { %v513_v59 = vshrl.u32 %v495_v50, %v511_v53  ;;  %v516_v60 = vadd.s32 127, %v515_v54  ;;  %v1395_v53 = vpack.c.bf16 %v766_v45, %v762_v37 }
  0x92   : > { %v419_v58 = vmul.f32 %v418_v49, %v416_v51  ;;  %v1393_v51 = vpack.c.bf16 %v767_v29, %v763_v26  ;;  %vm534_vm14 = vcmp.eq.s32.totalorder %v532_v48, 0 }
  0x93   : > { %v514_v62 = vor.u32 %v513_v59, %v512_v52  ;;  %v517_v55 = vshll.u32 %v516_v60, 23  ;;  %v1403_v52 = vpack.c.bf16 %v768_v47, %v764_v46  ;;  %v771_v60 = vld [vmem:[#allocation2 + $0x88] sm:$0x1] }
  0x94   : > { %v420_v61 = vxor.u32 2147483648, %v419_v58 }
  0x95   : > { %v518_v3 = vor.u32 4788187, %v517_v55  ;;  %v521_v4 = vcvt.s32.f32 %v514_v62 }
  0x96   : > { %v421_v63 = vsel %vm338_vm15, %v420_v61, %v419_v58  ;;  %vm537_vm15 = vcmp.eq.s32.totalorder %v532_v48, 2  ;;  %v773_v61 = vld [vmem:[#allocation2 + $0x98] sm:$0x1] }
  0x97   : > { %v424_v1 = vsel %vm337_vm1, %v1842_v31, %v421_v63  ;;  %v519_v5 = vand.u32 2147483647, %v518_v3  ;;  %vm743_vm1 = vcmp.lt.s32.totalorder %v742_v38, 2 }
  0x98   : > { %1506 = vcosq.f32 %v424_v1 }
  0x99   : > { %1508 = vsinq.f32 %v424_v1  ;;  %v522_v9 = vmul.f32 %v521_v4, %v519_v5  ;;  %v770_v4 = vld [vmem:[#allocation2 + $0x80] sm:$0x1] }
  0x9b   : > { %v523_v35 = vxor.u32 2147483648, %v522_v9 }
  0x9d   : > { %v524_v13 = vsel %vm441_vm2, %v523_v35, %v522_v9  ;;  %vm531_vm2 = vweird.f32 %v1844_v32 }
  0x9e   : > { %v527_v14 = vsel %vm440_vm3, %v1844_v32, %v524_v13  ;;  %vm533_vm3 = vcmp.lt.s32.totalorder %v532_v48, 2  ;;  %v1162_v13 = vld [vmem:[%s2014_s4] sm:$0xff] }
  0x9f   : > { %1510 = vcosq.f32 %v527_v14  ;;  %v1164_v6 = vrot.slane %v1162_v13, 5 }
  0xa0   : > { %1512 = vsinq.f32 %v527_v14 }
  0xa2   : > { %v1507_v16 = vpop.eup %1506 }
  0xa3   : > { %v1509_v39 = vpop.eup %1508  ;;  %v435_v17 = vxor.u32 2147483648, %v1507_v16 }
  0xa4   : > { %v432_v20 = vxor.u32 2147483648, %v1509_v39 }
  0xa5   : > { %v436_v22 = vsel %vm434_vm4, %v435_v17, %v1509_v39  ;;  %v645_v23 = vsel %vm643_vm5, %v435_v17, %v1509_v39  ;;  %vm1149_vm4 = vcmask 1041408  }
  0xa6   : > { %v433_v27 = vsel %vm431_vm6, %v1507_v16, %v432_v20  ;;  %v642_v28 = vsel %vm640_vm7, %v1507_v16, %v432_v20 }
  0xa7   : > { %v437_v33 = vsel %vm430_vm8, %v433_v27, %v436_v22  ;;  %v646_v34 = vsel %vm639_vm9, %v642_v28, %v645_v23 }
  0xa8   : > { %v438_v40 = vsel %vm428_vm10, nan, %v437_v33  ;;  %v647_v41 = vsel %vm428_vm10, nan, %v646_v34 }
  0xa9   : > { %v542_v49 = vmul.f32 %v438_v40, %v332_v19  ;;  %v752_v50 = vmul.f32 %v647_v41, %v332_v19  ;;  %v1511_v43 = vpop.eup %1510 }
  0xaa   : > { %v1513_v54 = vpop.eup %1512  ;;  %v538_v31 = vxor.u32 2147483648, %v1511_v43 }
  0xab   : > { %1353 = vmatmul.mubr.msk.f32.vlgmr.msra.gmra.mrb[0].mxu0 %vm794_vm11, %v752_v50  ;;  %1357 = vmatmul.mubr.msk.f32.vlgmr.msra.gmra.mrb[0].mxu1 %vm794_vm11, %v752_v50  ;;  %v535_v58 = vxor.u32 2147483648, %v1513_v54 }
  0xac   : > { %1392 = vmatpush1.bf16.msra.mxu0 %v1391_v36  ;;  %1400 = vmatpush1.bf16.msra.mxu1 %v1399_v44  ;;  %v749_v59 = vsel %vm747_vm12, %v538_v31, %v1513_v54  ;;  %v539_v63 = vsel %vm537_vm15, %v538_v31, %v1513_v54 }
  0xad   : > { %1394 = vmatprep.subr.bf16.mxu0 %v1393_v51  ;;  %1402 = vmatprep.subr.bf16.mxu1 %v1401_v42  ;;  %v746_v62 = vsel %vm744_vm13, %v1511_v43, %v535_v58  ;;  %v536_v55 = vsel %vm534_vm14, %v1511_v43, %v535_v58 }
  0xae   : > { %884 = vmatprep.mubr.f32.mxu0 %v1662_v0  ;;  %961 = vmatprep.mubr.f32.mxu1 %v1662_v0  ;;  %v750_v1 = vsel %vm743_vm1, %v746_v62, %v749_v59  ;;  %v540_v5 = vsel %vm533_vm3, %v536_v55, %v539_v63 }
  0xaf   : > { %v751_v2 = vsel %vm531_vm2, nan, %v750_v1  ;;  %v541_v8 = vsel %vm531_vm2, nan, %v540_v5 }
  0xb0   : > { %1396 = vmatpush1.bf16.msra.mxu0 %v1395_v53  ;;  %1404 = vmatpush1.bf16.msra.mxu1 %v1403_v52  ;;  %v753_v3 = vmul.f32 %v751_v2, %v333_v56  ;;  %v543_v9 = vmul.f32 %v541_v8, %v333_v56 }
  0xb1   : > { %1359 = vmatprep.subr.msk.mxu0 %vm801_vm0, %v771_v60  ;;  %1363 = vmatprep.subr.msk.mxu1 %vm801_vm0, %v773_v61 }
  0xb2   : > { %1354 = vmatmul.mubr.msk.f32.gmra.mrb[2].mxu0 %vm794_vm11, %v753_v3  ;;  %1358 = vmatmul.mubr.msk.f32.gmra.mrb[2].mxu1 %vm794_vm11, %v753_v3 }
  0xb3   : > { %1049 = vmatprep.mubr.f32.mxu0 %v1662_v0  ;;  %1126 = vmatprep.mubr.f32.mxu1 %v1662_v0 }
  0xb4   : > { %1360 = vmatpush1.msk.msra.mxu0 %vm801_vm0, %v770_v4  ;;  %1364 = vmatpush1.msk.msra.mxu1 %vm801_vm0, %v772_v7 }
  0xb6   : > { %1361 = vmatmul.mubr.msk.f32.vlgmr.msra.gmra.mrb[0].mxu0 %vm794_vm11, %v542_v49  ;;  %1365 = vmatmul.mubr.msk.f32.vlgmr.msra.gmra.mrb[0].mxu1 %vm794_vm11, %v542_v49 }
  0xb7   : > { %1055 = vmatprep.mubr.f32.mxu0 %v1662_v0  ;;  %1132 = vmatprep.mubr.f32.mxu1 %v1662_v0 }
  0xba   : > { %1362 = vmatmul.mubr.msk.f32.gmra.mrb[2].mxu0 %vm794_vm11, %v543_v9  ;;  %1366 = vmatmul.mubr.msk.f32.gmra.mrb[2].mxu1 %vm794_vm11, %v543_v9 }
 0x189   : > { %v1051_v32 = vpop.f32.mrb[0].mxu0  ;;  %v1128_v35 = vpop.f32.mrb[0].mxu1 }
 0x18a   : > { %v1053_v10 = vpop.f32.mrb[1].mxu0  ;;  %v1130_v11 = vpop.f32.mrb[1].mxu1  ;;  %v1150_v14 = vrot.slane %v1128_v35, 6 }
 0x18b   : > { %v1140_v12 = vrot.slane %v1053_v10, 7  ;;  %v1158_v20 = vrot.slane %v1130_v11, 5 }
 0x18d   : > { %v1145_v15 = vadd.f32 %v1140_v12, %v1051_v32  ;;  %v1057_v16 = vpop.f32.mrb[2].mxu0  ;;  %v1134_v39 = vpop.f32.mrb[2].mxu1 }
 0x18e   : > { %v1151_v0 = vrot.slane %v1134_v39, 6  ;;  %v1059_v17 = vpop.f32.mrb[3].mxu0  ;;  %v1136_v18 = vpop.f32.mrb[3].mxu1 }
 0x18f   : > { %v1155_v19 = vadd.f32 %v1150_v14, %v1145_v15  ;;  %v1141_v21 = vrot.slane %v1059_v17, 7 }
 0x190   : > { %v1152_v22 = vsel %vm1149_vm4, %v1150_v14, %v1151_v0 }
 0x191   : > { %v1160_v23 = vadd.f32 %v1158_v20, %v1155_v19  ;;  %v1142_v24 = vsel %vm801_vm0, %v1140_v12, %v1141_v21 }
 0x192   : > { %v1146_v25 = vadd.f32 %v1142_v24, %v1057_v16 }
 0x193   : > { %v1166_v26 = vmul.f32 %v1164_v6, %v1160_v23 }
 0x194   : > { %v1156_v27 = vadd.f32 %v1152_v22, %v1146_v25 }
 0x195   : > { %1168 = vst [vmem:[%s309_s29 - $0x3] sm:$0xf8] %v1166_v26 }
 0x196   : > { %v1161_v28 = vadd.f32 %v1158_v20, %v1156_v27 }
 0x198   : > { %v1167_v29 = vmul.f32 %v1164_v6, %v1161_v28 }
 0x19a   : > { %1169 = vst [vmem:[%s309_s29 + $0x5] sm:$0x7] %v1167_v29 }
 0x19b   : > { %1583 = shalt.err (!%p1580_p6)
}
 0x19c   : > { %s1584_s15 = scalar_lea.hbm %s1963_s8, 128  ;;  %s1588_s24 = scalar_lea.hbm %s2015_s5, 256 }
 0x19d   : > { %p1585_p7 = scmp.ne.s32.totalorder %s1963_s8, %s1584_s15  ;;  %p1589_p0 = scmp.lt.u32.totalorder %s1963_s8, %s2015_s5 }
 0x19e   : > { %p1590_p4 = scmp.lt.u32.totalorder %s1588_s24, %s1584_s15  ;;  %p1592_p1 = scmp.lt.u32.totalorder %s1584_s15, %s1963_s8 }
 0x19f   : > { %p1586_p9 = pnand %p1585_p7, %p2029_p8 }
 0x1a0   : > { %p1591_p13 = por %p1590_p4, %p1589_p0 }
 0x1a1   : > { %p1587_p12 = pneg %p1586_p9 }
 0x1a2   : > { %p1593_p10 = por %p1592_p1, %p1591_p13 }
 0x1a4   : > { %p1594_p11 = pnand %p1593_p10, %p1587_p12 }
 0x1a6   : > { %1597 = shalt.err (!%p1594_p11)
}
 0x1a7   : > { %1429 = dma.vmem_to_hbm [thread:$0]  (%p2029_p8), %s1965_s26, 128, %s1963_s8, %s1171_s11  }
 0x1a8 PF: > { %p1446_p2 = scmp.ge.s32.totalorder %s1656_s23, 2  ;;  %s1197_s29 = sand.u32 1, %s1636_s18  }
 0x1a9   : > { %p2030_p3 = scmp.ne.s32.totalorder %s2023_s30, 0  ;;  %s1198_s10 = scalar_lea.sflag [#allocation4], %s1197_s29 }
 0x1ab   : > { %p1439_p5 = pnand %p1446_p2, %p2030_p3 }
 0x1ad   : > { %1631 = dma.done.wait (!%p1439_p5), %s1198_s10, 128  }
 0x1ae   : > { %1633 = vsyncadd (!%p1439_p5), %s1198_s10, 4294967168  ;;  %s20_s23 = sadd.s32 1, %s1656_s23   ;;  %s2031_s28 = sld [smem:[#allocation11_spill]] }
 0x1af   : > { %p17_p6 = scmp.ge.s32.totalorder %s20_s23, 4   ;;  %s2032_s18 = smov %s1640_s19 }
 0x1b0   : > { %s2033_s19 = smov %s1644_s20  ;;  %s2034_s20 = smov %s1753_s6 }
 0x1b1   : > { %s2035_s21 = smov %s1652_s22  ;;  %19 = sbr.rel (!%p17_p6) target bundleno = 6 (0x6), region = 90 }
 0x1b4   : > { %s2036_s22 = smov %s2031_s28 }
 0x1b8   :  { %1203 = vsyncpa [#allocation3], 1 }
 0x1b9   :  { %1205 = vsyncpa [#allocation3 + $0x1], 1 }
 0x1ba   :  { %1206 = vsyncpa [#allocation6], 1 }
 0x1bb   :  { %1207 = vsyncpa [#allocation4], 1 }
 0x1bc   :  { %1209 = vsyncpa [#allocation4 + $0x1], 1 }

</bundles_post_ra>
